<compile_context>
chip_gen: v5e
topology: v5e:2x2
jax: 0.10.0
libtpu: 0.0.40
codegen_flags: <defaults>
</compile_context>

<pallas_src>
import jax
import jax.numpy as jnp
from jax import lax
from jax.experimental import pallas as pl
from jax.experimental.pallas import tpu as pltpu

# ----- tiny DistilBERT-like config (synthetic) -----
VOCAB = 64
MAX_LEN = 16
D = 128          # emb_dim (hidden size)
H = 2            # attention heads
HD = D // H      # head dim
FFN = 256
N_LAYERS = 2
LN_EPS = 1e-12
QA_PAD = 128     # lane-dense padded width for the fused start/end head
ATTN_SCALE = 1.0 / (HD ** 0.5)
NEG_INF = -1e30


def _layernorm(x, gamma, beta):
    mu = jnp.mean(x, axis=-1, keepdims=True)
    var = jnp.mean((x - mu) ** 2, axis=-1, keepdims=True)
    return (x - mu) * lax.rsqrt(var + LN_EPS) * gamma + beta


# ---------------- fused Pallas kernel (whole forward pass, single grid step) ----------------
def fused_forward_kernel(ids_ref, pos_ref, tt_ref, bias_ref,
                         word_emb, pos_emb, emb_g, emb_b,
                         wqkv, bqkv, wo, bo,
                         g1, b1, w1, c1, w2, c2, g2, b2,
                         wse, bse,
                         logits_ref):
    BS = ids_ref.shape[0]                                      # flattened B*S rows

    # --- in-kernel embedding gather: one-hot MXU matmuls against VMEM tables ---
    word_oh = (ids_ref[...] ==
               lax.broadcasted_iota(jnp.int32, (BS, VOCAB), 1)).astype(jnp.float32)
    pos_oh = (pos_ref[...] ==
              lax.broadcasted_iota(jnp.int32, (BS, MAX_LEN), 1)).astype(jnp.float32)
    emb = (jnp.dot(word_oh, word_emb[...], preferred_element_type=jnp.float32)
           + jnp.dot(pos_oh, pos_emb[...], preferred_element_type=jnp.float32))
    x = _layernorm(emb, emb_g[...], emb_b[...])                # (BS, D) f32

    mask_bias = bias_ref[...]                                  # (BS, BS) additive, block-diag, hoisted

    for l in range(N_LAYERS):                                  # static layer loop, weights VMEM-resident
        # --- fused QKV projection; single bf16 cast after bias add ---
        xb = x.astype(jnp.bfloat16)
        qkv = (jnp.dot(xb, wqkv[l], preferred_element_type=jnp.float32)
               + bqkv[l]).astype(jnp.bfloat16)                 # (BS, 3D) bf16

        ctx_parts = []
        for h in range(H):                                     # static head loop
            qh = qkv[:, h * HD:(h + 1) * HD]                   # scale pre-folded into Wq/bq
            kh = qkv[:, D + h * HD:D + (h + 1) * HD]
            vh = qkv[:, 2 * D + h * HD:2 * D + (h + 1) * HD]
            s = jnp.dot(qh, kh.T, preferred_element_type=jnp.float32) + mask_bias
            s = s - jnp.max(s, axis=-1, keepdims=True)
            p = jnp.exp(s)
            p = p * pl.reciprocal(jnp.sum(p, axis=-1, keepdims=True), approx=True)
            ctx_parts.append(jnp.dot(p.astype(jnp.bfloat16), vh,
                                     preferred_element_type=jnp.float32))   # (BS, HD)

        # lane-concat heads -> single K=128 output projection
        ctx = jnp.concatenate(ctx_parts, axis=-1).astype(jnp.bfloat16)       # (BS, D)
        attn = jnp.dot(ctx, wo[l], preferred_element_type=jnp.float32) + bo[l]

        h1 = _layernorm(x + attn, g1[l], b1[l])                # sa_layer_norm (f32)

        f = jnp.dot(h1.astype(jnp.bfloat16), w1[l],
                    preferred_element_type=jnp.float32) + c1[l]
        f = jax.nn.gelu(f, approximate=True)                   # tanh approx -> EUP slot
        f = jnp.dot(f.astype(jnp.bfloat16), w2[l],
                    preferred_element_type=jnp.float32) + c2[l]

        x = _layernorm(h1 + f, g2[l], b2[l])                   # output_layer_norm (f32)

    # --- QA head: context masking by token_type + fused lane-dense start/end head ---
    ctx_h = x * tt_ref[...]                                    # (BS, D) * (BS, 1)
    logits_ref[...] = (jnp.dot(ctx_h.astype(jnp.bfloat16), wse[...],
                               preferred_element_type=jnp.float32) + bse[...])   # (BS, 128)


# ---------------- wrapper ----------------
def _full(shape):
    n = len(shape)
    return pl.BlockSpec(shape, lambda i, n=n: (0,) * n)


def fused_forward(ids, pos, tt, mask_bias, p):
    BS = ids.shape[0]
    in_specs = [
        _full((BS, 1)), _full((BS, 1)), _full((BS, 1)), _full((BS, BS)),
        _full((VOCAB, D)), _full((MAX_LEN, D)), _full((1, D)), _full((1, D)),
        _full((N_LAYERS, D, 3 * D)), _full((N_LAYERS, 1, 3 * D)),   # fused QKV
        _full((N_LAYERS, D, D)), _full((N_LAYERS, 1, D)),           # attn out proj
        _full((N_LAYERS, 1, D)), _full((N_LAYERS, 1, D)),           # sa_ln gamma/beta
        _full((N_LAYERS, D, FFN)), _full((N_LAYERS, 1, FFN)),       # ffn lin1
        _full((N_LAYERS, FFN, D)), _full((N_LAYERS, 1, D)),         # ffn lin2
        _full((N_LAYERS, 1, D)), _full((N_LAYERS, 1, D)),           # out_ln gamma/beta
        _full((D, QA_PAD)), _full((1, QA_PAD)),                     # fused start/end head
    ]
    return pl.pallas_call(
        fused_forward_kernel,
        out_shape=jax.ShapeDtypeStruct((BS, QA_PAD), jnp.float32),
        grid=(1,),
        in_specs=in_specs,
        out_specs=_full((BS, QA_PAD)),
        compiler_params=pltpu.CompilerParams(dimension_semantics=("arbitrary",)),
    )(ids, pos, tt, mask_bias,
      p["word_emb"], p["pos_emb"], p["emb_ln_g"], p["emb_ln_b"],
      p["wqkv"], p["bqkv"], p["wo"], p["bo"],
      p["g1"], p["b1"], p["w1"], p["c1"], p["w2"], p["c2"], p["g2"], p["b2"],
      p["w_se"], p["b_se"])


# ---------------- parameters (deterministic, synthetic) ----------------
def init_params(key):
    keys = iter(jax.random.split(key, 64))

    def nrm(shape):
        return 0.02 * jax.random.normal(next(keys), shape, jnp.float32)

    def zeros(shape):
        return jnp.zeros(shape, jnp.float32)

    def ones(shape):
        return jnp.ones(shape, jnp.float32)

    def stack(fn, shape):
        return jnp.stack([fn(shape) for _ in range(N_LAYERS)], axis=0)

    # fused QKV weights; attention scale 1/sqrt(HD) pre-folded into the Q third
    wqkv = stack(nrm, (D, 3 * D))
    bqkv = stack(zeros, (1, 3 * D))
    wqkv = wqkv.at[:, :, 0:D].multiply(ATTN_SCALE)
    bqkv = bqkv.at[:, :, 0:D].multiply(ATTN_SCALE)

    # fused, lane-padded start/end head: lane 0 = start, lane 1 = end
    w_se = jnp.zeros((D, QA_PAD), jnp.float32)
    w_se = w_se.at[:, 0:1].set(nrm((D, 1))).at[:, 1:2].set(nrm((D, 1)))

    return {
        "word_emb": nrm((VOCAB, D)),
        "pos_emb": nrm((MAX_LEN, D)),
        "emb_ln_g": ones((1, D)),
        "emb_ln_b": zeros((1, D)),
        "wqkv": wqkv.astype(jnp.bfloat16), "bqkv": bqkv,
        "wo": stack(nrm, (D, D)).astype(jnp.bfloat16), "bo": stack(zeros, (1, D)),
        "g1": stack(ones, (1, D)), "b1": stack(zeros, (1, D)),
        "w1": stack(nrm, (D, FFN)).astype(jnp.bfloat16), "c1": stack(zeros, (1, FFN)),
        "w2": stack(nrm, (FFN, D)).astype(jnp.bfloat16), "c2": stack(zeros, (1, D)),
        "g2": stack(ones, (1, D)), "b2": stack(zeros, (1, D)),
        "w_se": w_se.astype(jnp.bfloat16), "b_se": jnp.zeros((1, QA_PAD), jnp.float32),
    }


def forward(params, input_ids, token_type_ids, attention_mask):
    B, S = input_ids.shape
    BS = B * S

    ids = input_ids.reshape(BS, 1).astype(jnp.int32)
    pos = jnp.tile(jnp.arange(S, dtype=jnp.int32), B).reshape(BS, 1)
    tt = token_type_ids.astype(jnp.float32).reshape(BS, 1)

    # block-diagonal additive attention mask: rows may only attend to keys in the
    # same batch element with attention_mask == 1.
    batch_of_row = jnp.repeat(jnp.arange(B, dtype=jnp.int32), S)           # (BS,)
    same_batch = batch_of_row[:, None] == batch_of_row[None, :]
    key_valid = attention_mask.reshape(BS) > 0
    mask_bias = jnp.where(same_batch & key_valid[None, :], 0.0, NEG_INF).astype(jnp.float32)

    logits = fused_forward(ids, pos, tt, mask_bias, params).reshape(B, S, QA_PAD)
    start_logits = logits[..., 0:1]
    end_logits = logits[..., 1:2]
    return start_logits, end_logits


if __name__ == "__main__":
    B, S = 2, 8
    key = jax.random.PRNGKey(0)
    k_params, k_ids = jax.random.split(key)

    params = init_params(k_params)
    input_ids = jax.random.randint(k_ids, (B, S), 0, VOCAB, dtype=jnp.int32)
    # question tokens (0) followed by context tokens (1)
    token_type_ids = jnp.concatenate(
        [jnp.zeros((B, S // 2), jnp.int32), jnp.ones((B, S // 2), jnp.int32)], axis=1)
    attention_mask = jnp.ones((B, S), jnp.int32)

    start_logits, end_logits = forward(params, input_ids, token_type_ids, attention_mask)
    jax.block_until_ready((start_logits, end_logits))

    assert start_logits.shape == (B, S, 1) and end_logits.shape == (B, S, 1)
    assert jnp.all(jnp.isfinite(start_logits)) and jnp.all(jnp.isfinite(end_logits))
    print("KERNEL_OK")
</pallas_src>

<mosaic_0001>
module attributes {stable_mosaic.version = 11 : i64} {
  func.func @fused_forward_kernel(%arg0: i32, %arg1: memref<16x1xi32, #tpu.memory_space<vmem>>, %arg2: memref<16x1xi32, #tpu.memory_space<vmem>>, %arg3: memref<16x1xf32, #tpu.memory_space<vmem>>, %arg4: memref<16x16xf32, #tpu.memory_space<vmem>>, %arg5: memref<64x128xf32, #tpu.memory_space<vmem>>, %arg6: memref<16x128xf32, #tpu.memory_space<vmem>>, %arg7: memref<1x128xf32, #tpu.memory_space<vmem>>, %arg8: memref<1x128xf32, #tpu.memory_space<vmem>>, %arg9: memref<2x128x384xbf16, #tpu.memory_space<vmem>>, %arg10: memref<2x1x384xf32, #tpu.memory_space<vmem>>, %arg11: memref<2x128x128xbf16, #tpu.memory_space<vmem>>, %arg12: memref<2x1x128xf32, #tpu.memory_space<vmem>>, %arg13: memref<2x1x128xf32, #tpu.memory_space<vmem>>, %arg14: memref<2x1x128xf32, #tpu.memory_space<vmem>>, %arg15: memref<2x128x256xbf16, #tpu.memory_space<vmem>>, %arg16: memref<2x1x256xf32, #tpu.memory_space<vmem>>, %arg17: memref<2x256x128xbf16, #tpu.memory_space<vmem>>, %arg18: memref<2x1x128xf32, #tpu.memory_space<vmem>>, %arg19: memref<2x1x128xf32, #tpu.memory_space<vmem>>, %arg20: memref<2x1x128xf32, #tpu.memory_space<vmem>>, %arg21: memref<128x128xbf16, #tpu.memory_space<vmem>>, %arg22: memref<1x128xf32, #tpu.memory_space<vmem>>, %arg23: memref<16x128xf32, #tpu.memory_space<vmem>>) attributes {dimension_semantics = [#tpu.dimension_semantics<arbitrary>], iteration_bounds = array<i64: 1>, scalar_prefetch = 0 : i64, scratch_operands = 0 : i64, tpu.core_type = #tpu.core_type<tc>, window_params = [{pipeline_mode = #tpu.pipeline_mode<synchronous>, transform_indices = @transform_0, window_bounds = array<i64: 16, 1>}, {pipeline_mode = #tpu.pipeline_mode<synchronous>, transform_indices = @transform_1, window_bounds = array<i64: 16, 1>}, {pipeline_mode = #tpu.pipeline_mode<synchronous>, transform_indices = @transform_2, window_bounds = array<i64: 16, 1>}, {pipeline_mode = #tpu.pipeline_mode<synchronous>, transform_indices = @transform_3, window_bounds = array<i64: 16, 16>}, {pipeline_mode = #tpu.pipeline_mode<synchronous>, transform_indices = @transform_4, window_bounds = array<i64: 64, 128>}, {pipeline_mode = #tpu.pipeline_mode<synchronous>, transform_indices = @transform_5, window_bounds = array<i64: 16, 128>}, {pipeline_mode = #tpu.pipeline_mode<synchronous>, transform_indices = @transform_6, window_bounds = array<i64: 1, 128>}, {pipeline_mode = #tpu.pipeline_mode<synchronous>, transform_indices = @transform_7, window_bounds = array<i64: 1, 128>}, {pipeline_mode = #tpu.pipeline_mode<synchronous>, transform_indices = @transform_8, window_bounds = array<i64: 2, 128, 384>}, {pipeline_mode = #tpu.pipeline_mode<synchronous>, transform_indices = @transform_9, window_bounds = array<i64: 2, 1, 384>}, {pipeline_mode = #tpu.pipeline_mode<synchronous>, transform_indices = @transform_10, window_bounds = array<i64: 2, 128, 128>}, {pipeline_mode = #tpu.pipeline_mode<synchronous>, transform_indices = @transform_11, window_bounds = array<i64: 2, 1, 128>}, {pipeline_mode = #tpu.pipeline_mode<synchronous>, transform_indices = @transform_12, window_bounds = array<i64: 2, 1, 128>}, {pipeline_mode = #tpu.pipeline_mode<synchronous>, transform_indices = @transform_13, window_bounds = array<i64: 2, 1, 128>}, {pipeline_mode = #tpu.pipeline_mode<synchronous>, transform_indices = @transform_14, window_bounds = array<i64: 2, 128, 256>}, {pipeline_mode = #tpu.pipeline_mode<synchronous>, transform_indices = @transform_15, window_bounds = array<i64: 2, 1, 256>}, {pipeline_mode = #tpu.pipeline_mode<synchronous>, transform_indices = @transform_16, window_bounds = array<i64: 2, 256, 128>}, {pipeline_mode = #tpu.pipeline_mode<synchronous>, transform_indices = @transform_17, window_bounds = array<i64: 2, 1, 128>}, {pipeline_mode = #tpu.pipeline_mode<synchronous>, transform_indices = @transform_18, window_bounds = array<i64: 2, 1, 128>}, {pipeline_mode = #tpu.pipeline_mode<synchronous>, transform_indices = @transform_19, window_bounds = array<i64: 2, 1, 128>}, {pipeline_mode = #tpu.pipeline_mode<synchronous>, transform_indices = @transform_20, window_bounds = array<i64: 128, 128>}, {pipeline_mode = #tpu.pipeline_mode<synchronous>, transform_indices = @transform_21, window_bounds = array<i64: 1, 128>}, {pipeline_mode = #tpu.pipeline_mode<synchronous>, transform_indices = @transform_22, window_bounds = array<i64: 16, 128>}]} {
    %c0 = arith.constant 0 : index
    %c0_0 = arith.constant 0 : index
    %0 = vector.load %arg1[%c0, %c0_0] : memref<16x1xi32, #tpu.memory_space<vmem>>, vector<16x1xi32>
    %1 = tpu.iota {dimensions = array<i32: 1>} : vector<16x64xi32>
    %2 = vector.broadcast %0 : vector<16x1xi32> to vector<16x64xi32>
    %3 = arith.cmpi eq, %2, %1 : vector<16x64xi32>
    %4 = arith.extui %3 : vector<16x64xi1> to vector<16x64xi32>
    %5 = arith.sitofp %4 : vector<16x64xi32> to vector<16x64xf32>
    %c0_1 = arith.constant 0 : index
    %c0_2 = arith.constant 0 : index
    %6 = vector.load %arg2[%c0_1, %c0_2] : memref<16x1xi32, #tpu.memory_space<vmem>>, vector<16x1xi32>
    %7 = tpu.iota {dimensions = array<i32: 1>} : vector<16x16xi32>
    %8 = vector.broadcast %6 : vector<16x1xi32> to vector<16x16xi32>
    %9 = arith.cmpi eq, %8, %7 : vector<16x16xi32>
    %10 = arith.extui %9 : vector<16x16xi1> to vector<16x16xi32>
    %11 = arith.sitofp %10 : vector<16x16xi32> to vector<16x16xf32>
    %c0_3 = arith.constant 0 : index
    %c0_4 = arith.constant 0 : index
    %12 = vector.load %arg5[%c0_3, %c0_4] : memref<64x128xf32, #tpu.memory_space<vmem>>, vector<64x128xf32>
    %cst = arith.constant dense<0.000000e+00> : vector<16x128xf32>
    %13 = tpu.matmul %5, %12, %cst {dimension_numbers = #tpu.dot_dimension_numbers<[1], [0], [0], [1], [0, 0, 1, 1], [], []>} : vector<16x64xf32>, vector<64x128xf32>, vector<16x128xf32> -> vector<16x128xf32>
    %c0_5 = arith.constant 0 : index
    %c0_6 = arith.constant 0 : index
    %14 = vector.load %arg6[%c0_5, %c0_6] : memref<16x128xf32, #tpu.memory_space<vmem>>, vector<16x128xf32>
    %cst_7 = arith.constant dense<0.000000e+00> : vector<16x128xf32>
    %15 = tpu.matmul %11, %14, %cst_7 {dimension_numbers = #tpu.dot_dimension_numbers<[1], [0], [0], [1], [0, 0, 1, 1], [], []>} : vector<16x16xf32>, vector<16x128xf32>, vector<16x128xf32> -> vector<16x128xf32>
    %16 = arith.addf %13, %15 : vector<16x128xf32>
    %c0_8 = arith.constant 0 : index
    %c0_9 = arith.constant 0 : index
    %17 = vector.load %arg7[%c0_8, %c0_9] : memref<1x128xf32, #tpu.memory_space<vmem>>, vector<1x128xf32>
    %c0_10 = arith.constant 0 : index
    %c0_11 = arith.constant 0 : index
    %18 = vector.load %arg8[%c0_10, %c0_11] : memref<1x128xf32, #tpu.memory_space<vmem>>, vector<1x128xf32>
    %cst_12 = arith.constant dense<0.000000e+00> : vector<16xf32>
    %19 = vector.multi_reduction <add>, %16, %cst_12 [1] : vector<16x128xf32> to vector<16xf32>
    %20 = vector.shape_cast %19 : vector<16xf32> to vector<16x1xf32>
    %cst_13 = arith.constant 1.280000e+02 : f32
    %21 = vector.broadcast %cst_13 : f32 to vector<16x1xf32>
    %22 = arith.divf %20, %21 : vector<16x1xf32>
    %23 = vector.broadcast %22 : vector<16x1xf32> to vector<16x128xf32>
    %24 = arith.subf %16, %23 : vector<16x128xf32>
    %25 = arith.mulf %24, %24 : vector<16x128xf32>
    %cst_14 = arith.constant dense<0.000000e+00> : vector<16xf32>
    %26 = vector.multi_reduction <add>, %25, %cst_14 [1] : vector<16x128xf32> to vector<16xf32>
    %27 = vector.shape_cast %26 : vector<16xf32> to vector<16x1xf32>
    %cst_15 = arith.constant 1.280000e+02 : f32
    %28 = vector.broadcast %cst_15 : f32 to vector<16x1xf32>
    %29 = arith.divf %27, %28 : vector<16x1xf32>
    %30 = vector.broadcast %22 : vector<16x1xf32> to vector<16x128xf32>
    %31 = arith.subf %16, %30 : vector<16x128xf32>
    %cst_16 = arith.constant 9.99999996E-13 : f32
    %32 = vector.broadcast %cst_16 : f32 to vector<16x1xf32>
    %33 = arith.addf %29, %32 : vector<16x1xf32>
    %34 = math.rsqrt %33 : vector<16x1xf32>
    %35 = vector.broadcast %34 : vector<16x1xf32> to vector<16x128xf32>
    %36 = arith.mulf %31, %35 : vector<16x128xf32>
    %37 = vector.broadcast %17 : vector<1x128xf32> to vector<16x128xf32>
    %38 = arith.mulf %36, %37 : vector<16x128xf32>
    %39 = vector.broadcast %18 : vector<1x128xf32> to vector<16x128xf32>
    %40 = arith.addf %38, %39 : vector<16x128xf32>
    %c0_17 = arith.constant 0 : index
    %c0_18 = arith.constant 0 : index
    %41 = vector.load %arg4[%c0_17, %c0_18] : memref<16x16xf32, #tpu.memory_space<vmem>>, vector<16x16xf32>
    %42 = arith.truncf %40 : vector<16x128xf32> to vector<16x128xbf16>
    %c0_19 = arith.constant 0 : index
    %c0_20 = arith.constant 0 : index
    %c0_21 = arith.constant 0 : index
    %43 = vector.load %arg9[%c0_19, %c0_20, %c0_21] : memref<2x128x384xbf16, #tpu.memory_space<vmem>>, vector<1x128x384xbf16>
    %44 = vector.shape_cast %43 : vector<1x128x384xbf16> to vector<128x384xbf16>
    %cst_22 = arith.constant dense<0.000000e+00> : vector<16x384xf32>
    %45 = tpu.matmul %42, %44, %cst_22 {dimension_numbers = #tpu.dot_dimension_numbers<[1], [0], [0], [1], [0, 0, 1, 1], [], []>} : vector<16x128xbf16>, vector<128x384xbf16>, vector<16x384xf32> -> vector<16x384xf32>
    %c0_23 = arith.constant 0 : index
    %c0_24 = arith.constant 0 : index
    %c0_25 = arith.constant 0 : index
    %46 = vector.load %arg10[%c0_23, %c0_24, %c0_25] : memref<2x1x384xf32, #tpu.memory_space<vmem>>, vector<1x1x384xf32>
    %47 = vector.shape_cast %46 : vector<1x1x384xf32> to vector<1x384xf32>
    %48 = vector.broadcast %47 : vector<1x384xf32> to vector<16x384xf32>
    %49 = arith.addf %45, %48 : vector<16x384xf32>
    %50 = arith.truncf %49 : vector<16x384xf32> to vector<16x384xbf16>
    %51 = vector.extract_strided_slice %50 {offsets = [0, 0], sizes = [16, 64], strides = [1, 1]} : vector<16x384xbf16> to vector<16x64xbf16>
    %52 = vector.extract_strided_slice %50 {offsets = [0, 128], sizes = [16, 64], strides = [1, 1]} : vector<16x384xbf16> to vector<16x64xbf16>
    %53 = vector.extract_strided_slice %50 {offsets = [0, 256], sizes = [16, 64], strides = [1, 1]} : vector<16x384xbf16> to vector<16x64xbf16>
    %54 = tpu.transpose %52, [1, 0] : vector<16x64xbf16> -> vector<64x16xbf16>
    %cst_26 = arith.constant dense<0.000000e+00> : vector<16x16xf32>
    %55 = tpu.matmul %51, %54, %cst_26 {dimension_numbers = #tpu.dot_dimension_numbers<[1], [0], [0], [1], [0, 0, 1, 1], [], []>} : vector<16x64xbf16>, vector<64x16xbf16>, vector<16x16xf32> -> vector<16x16xf32>
    %56 = arith.addf %55, %41 : vector<16x16xf32>
    %cst_27 = arith.constant dense<0xFF800000> : vector<16xf32>
    %57 = vector.multi_reduction <maximumf>, %56, %cst_27 [1] : vector<16x16xf32> to vector<16xf32>
    %58 = vector.shape_cast %57 : vector<16xf32> to vector<16x1xf32>
    %59 = vector.broadcast %58 : vector<16x1xf32> to vector<16x16xf32>
    %60 = arith.subf %56, %59 : vector<16x16xf32>
    %61 = math.exp %60 : vector<16x16xf32>
    %cst_28 = arith.constant dense<0.000000e+00> : vector<16xf32>
    %62 = vector.multi_reduction <add>, %61, %cst_28 [1] : vector<16x16xf32> to vector<16xf32>
    %63 = vector.shape_cast %62 : vector<16xf32> to vector<16x1xf32>
    %64 = tpu.reciprocal %63 {approx = true} : vector<16x1xf32> -> vector<16x1xf32>
    %65 = vector.broadcast %64 : vector<16x1xf32> to vector<16x16xf32>
    %66 = arith.mulf %61, %65 : vector<16x16xf32>
    %67 = arith.truncf %66 : vector<16x16xf32> to vector<16x16xbf16>
    %cst_29 = arith.constant dense<0.000000e+00> : vector<16x64xf32>
    %68 = tpu.matmul %67, %53, %cst_29 {dimension_numbers = #tpu.dot_dimension_numbers<[1], [0], [0], [1], [0, 0, 1, 1], [], []>} : vector<16x16xbf16>, vector<16x64xbf16>, vector<16x64xf32> -> vector<16x64xf32>
    %69 = vector.extract_strided_slice %50 {offsets = [0, 64], sizes = [16, 64], strides = [1, 1]} : vector<16x384xbf16> to vector<16x64xbf16>
    %70 = vector.extract_strided_slice %50 {offsets = [0, 192], sizes = [16, 64], strides = [1, 1]} : vector<16x384xbf16> to vector<16x64xbf16>
    %71 = vector.extract_strided_slice %50 {offsets = [0, 320], sizes = [16, 64], strides = [1, 1]} : vector<16x384xbf16> to vector<16x64xbf16>
    %72 = tpu.transpose %70, [1, 0] : vector<16x64xbf16> -> vector<64x16xbf16>
    %cst_30 = arith.constant dense<0.000000e+00> : vector<16x16xf32>
    %73 = tpu.matmul %69, %72, %cst_30 {dimension_numbers = #tpu.dot_dimension_numbers<[1], [0], [0], [1], [0, 0, 1, 1], [], []>} : vector<16x64xbf16>, vector<64x16xbf16>, vector<16x16xf32> -> vector<16x16xf32>
    %74 = arith.addf %73, %41 : vector<16x16xf32>
    %cst_31 = arith.constant dense<0xFF800000> : vector<16xf32>
    %75 = vector.multi_reduction <maximumf>, %74, %cst_31 [1] : vector<16x16xf32> to vector<16xf32>
    %76 = vector.shape_cast %75 : vector<16xf32> to vector<16x1xf32>
    %77 = vector.broadcast %76 : vector<16x1xf32> to vector<16x16xf32>
    %78 = arith.subf %74, %77 : vector<16x16xf32>
    %79 = math.exp %78 : vector<16x16xf32>
    %cst_32 = arith.constant dense<0.000000e+00> : vector<16xf32>
    %80 = vector.multi_reduction <add>, %79, %cst_32 [1] : vector<16x16xf32> to vector<16xf32>
    %81 = vector.shape_cast %80 : vector<16xf32> to vector<16x1xf32>
    %82 = tpu.reciprocal %81 {approx = true} : vector<16x1xf32> -> vector<16x1xf32>
    %83 = vector.broadcast %82 : vector<16x1xf32> to vector<16x16xf32>
    %84 = arith.mulf %79, %83 : vector<16x16xf32>
    %85 = arith.truncf %84 : vector<16x16xf32> to vector<16x16xbf16>
    %cst_33 = arith.constant dense<0.000000e+00> : vector<16x64xf32>
    %86 = tpu.matmul %85, %71, %cst_33 {dimension_numbers = #tpu.dot_dimension_numbers<[1], [0], [0], [1], [0, 0, 1, 1], [], []>} : vector<16x16xbf16>, vector<16x64xbf16>, vector<16x64xf32> -> vector<16x64xf32>
    %87 = tpu.concatenate %68, %86 in 1 : vector<16x64xf32>, vector<16x64xf32> -> vector<16x128xf32>
    %88 = arith.truncf %87 : vector<16x128xf32> to vector<16x128xbf16>
    %c0_34 = arith.constant 0 : index
    %c0_35 = arith.constant 0 : index
    %c0_36 = arith.constant 0 : index
    %89 = vector.load %arg11[%c0_34, %c0_35, %c0_36] : memref<2x128x128xbf16, #tpu.memory_space<vmem>>, vector<1x128x128xbf16>
    %90 = vector.shape_cast %89 : vector<1x128x128xbf16> to vector<128x128xbf16>
    %cst_37 = arith.constant dense<0.000000e+00> : vector<16x128xf32>
    %91 = tpu.matmul %88, %90, %cst_37 {dimension_numbers = #tpu.dot_dimension_numbers<[1], [0], [0], [1], [0, 0, 1, 1], [], []>} : vector<16x128xbf16>, vector<128x128xbf16>, vector<16x128xf32> -> vector<16x128xf32>
    %c0_38 = arith.constant 0 : index
    %c0_39 = arith.constant 0 : index
    %c0_40 = arith.constant 0 : index
    %92 = vector.load %arg12[%c0_38, %c0_39, %c0_40] : memref<2x1x128xf32, #tpu.memory_space<vmem>>, vector<1x1x128xf32>
    %93 = vector.shape_cast %92 : vector<1x1x128xf32> to vector<1x128xf32>
    %94 = vector.broadcast %93 : vector<1x128xf32> to vector<16x128xf32>
    %95 = arith.addf %91, %94 : vector<16x128xf32>
    %96 = arith.addf %40, %95 : vector<16x128xf32>
    %c0_41 = arith.constant 0 : index
    %c0_42 = arith.constant 0 : index
    %c0_43 = arith.constant 0 : index
    %97 = vector.load %arg13[%c0_41, %c0_42, %c0_43] : memref<2x1x128xf32, #tpu.memory_space<vmem>>, vector<1x1x128xf32>
    %98 = vector.shape_cast %97 : vector<1x1x128xf32> to vector<1x128xf32>
    %c0_44 = arith.constant 0 : index
    %c0_45 = arith.constant 0 : index
    %c0_46 = arith.constant 0 : index
    %99 = vector.load %arg14[%c0_44, %c0_45, %c0_46] : memref<2x1x128xf32, #tpu.memory_space<vmem>>, vector<1x1x128xf32>
    %100 = vector.shape_cast %99 : vector<1x1x128xf32> to vector<1x128xf32>
    %cst_47 = arith.constant dense<0.000000e+00> : vector<16xf32>
    %101 = vector.multi_reduction <add>, %96, %cst_47 [1] : vector<16x128xf32> to vector<16xf32>
    %102 = vector.shape_cast %101 : vector<16xf32> to vector<16x1xf32>
    %cst_48 = arith.constant 1.280000e+02 : f32
    %103 = vector.broadcast %cst_48 : f32 to vector<16x1xf32>
    %104 = arith.divf %102, %103 : vector<16x1xf32>
    %105 = vector.broadcast %104 : vector<16x1xf32> to vector<16x128xf32>
    %106 = arith.subf %96, %105 : vector<16x128xf32>
    %107 = arith.mulf %106, %106 : vector<16x128xf32>
    %cst_49 = arith.constant dense<0.000000e+00> : vector<16xf32>
    %108 = vector.multi_reduction <add>, %107, %cst_49 [1] : vector<16x128xf32> to vector<16xf32>
    %109 = vector.shape_cast %108 : vector<16xf32> to vector<16x1xf32>
    %cst_50 = arith.constant 1.280000e+02 : f32
    %110 = vector.broadcast %cst_50 : f32 to vector<16x1xf32>
    %111 = arith.divf %109, %110 : vector<16x1xf32>
    %112 = vector.broadcast %104 : vector<16x1xf32> to vector<16x128xf32>
    %113 = arith.subf %96, %112 : vector<16x128xf32>
    %cst_51 = arith.constant 9.99999996E-13 : f32
    %114 = vector.broadcast %cst_51 : f32 to vector<16x1xf32>
    %115 = arith.addf %111, %114 : vector<16x1xf32>
    %116 = math.rsqrt %115 : vector<16x1xf32>
    %117 = vector.broadcast %116 : vector<16x1xf32> to vector<16x128xf32>
    %118 = arith.mulf %113, %117 : vector<16x128xf32>
    %119 = vector.broadcast %98 : vector<1x128xf32> to vector<16x128xf32>
    %120 = arith.mulf %118, %119 : vector<16x128xf32>
    %121 = vector.broadcast %100 : vector<1x128xf32> to vector<16x128xf32>
    %122 = arith.addf %120, %121 : vector<16x128xf32>
    %123 = arith.truncf %122 : vector<16x128xf32> to vector<16x128xbf16>
    %c0_52 = arith.constant 0 : index
    %c0_53 = arith.constant 0 : index
    %c0_54 = arith.constant 0 : index
    %124 = vector.load %arg15[%c0_52, %c0_53, %c0_54] : memref<2x128x256xbf16, #tpu.memory_space<vmem>>, vector<1x128x256xbf16>
    %125 = vector.shape_cast %124 : vector<1x128x256xbf16> to vector<128x256xbf16>
    %cst_55 = arith.constant dense<0.000000e+00> : vector<16x256xf32>
    %126 = tpu.matmul %123, %125, %cst_55 {dimension_numbers = #tpu.dot_dimension_numbers<[1], [0], [0], [1], [0, 0, 1, 1], [], []>} : vector<16x128xbf16>, vector<128x256xbf16>, vector<16x256xf32> -> vector<16x256xf32>
    %c0_56 = arith.constant 0 : index
    %c0_57 = arith.constant 0 : index
    %c0_58 = arith.constant 0 : index
    %127 = vector.load %arg16[%c0_56, %c0_57, %c0_58] : memref<2x1x256xf32, #tpu.memory_space<vmem>>, vector<1x1x256xf32>
    %128 = vector.shape_cast %127 : vector<1x1x256xf32> to vector<1x256xf32>
    %129 = vector.broadcast %128 : vector<1x256xf32> to vector<16x256xf32>
    %130 = arith.addf %126, %129 : vector<16x256xf32>
    %131 = arith.mulf %130, %130 : vector<16x256xf32>
    %132 = arith.mulf %130, %131 : vector<16x256xf32>
    %cst_59 = arith.constant 4.471500e-02 : f32
    %133 = vector.broadcast %cst_59 : f32 to vector<16x256xf32>
    %134 = arith.mulf %133, %132 : vector<16x256xf32>
    %135 = arith.addf %130, %134 : vector<16x256xf32>
    %cst_60 = arith.constant 0.797884583 : f32
    %136 = vector.broadcast %cst_60 : f32 to vector<16x256xf32>
    %137 = arith.mulf %136, %135 : vector<16x256xf32>
    %138 = math.tanh %137 : vector<16x256xf32>
    %cst_61 = arith.constant 1.000000e+00 : f32
    %139 = vector.broadcast %cst_61 : f32 to vector<16x256xf32>
    %140 = arith.addf %139, %138 : vector<16x256xf32>
    %cst_62 = arith.constant 5.000000e-01 : f32
    %141 = vector.broadcast %cst_62 : f32 to vector<16x256xf32>
    %142 = arith.mulf %141, %140 : vector<16x256xf32>
    %143 = arith.mulf %130, %142 : vector<16x256xf32>
    %144 = arith.truncf %143 : vector<16x256xf32> to vector<16x256xbf16>
    %c0_63 = arith.constant 0 : index
    %c0_64 = arith.constant 0 : index
    %c0_65 = arith.constant 0 : index
    %145 = vector.load %arg17[%c0_63, %c0_64, %c0_65] : memref<2x256x128xbf16, #tpu.memory_space<vmem>>, vector<1x256x128xbf16>
    %146 = vector.shape_cast %145 : vector<1x256x128xbf16> to vector<256x128xbf16>
    %cst_66 = arith.constant dense<0.000000e+00> : vector<16x128xf32>
    %147 = tpu.matmul %144, %146, %cst_66 {dimension_numbers = #tpu.dot_dimension_numbers<[1], [0], [0], [1], [0, 0, 1, 1], [], []>} : vector<16x256xbf16>, vector<256x128xbf16>, vector<16x128xf32> -> vector<16x128xf32>
    %c0_67 = arith.constant 0 : index
    %c0_68 = arith.constant 0 : index
    %c0_69 = arith.constant 0 : index
    %148 = vector.load %arg18[%c0_67, %c0_68, %c0_69] : memref<2x1x128xf32, #tpu.memory_space<vmem>>, vector<1x1x128xf32>
    %149 = vector.shape_cast %148 : vector<1x1x128xf32> to vector<1x128xf32>
    %150 = vector.broadcast %149 : vector<1x128xf32> to vector<16x128xf32>
    %151 = arith.addf %147, %150 : vector<16x128xf32>
    %152 = arith.addf %122, %151 : vector<16x128xf32>
    %c0_70 = arith.constant 0 : index
    %c0_71 = arith.constant 0 : index
    %c0_72 = arith.constant 0 : index
    %153 = vector.load %arg19[%c0_70, %c0_71, %c0_72] : memref<2x1x128xf32, #tpu.memory_space<vmem>>, vector<1x1x128xf32>
    %154 = vector.shape_cast %153 : vector<1x1x128xf32> to vector<1x128xf32>
    %c0_73 = arith.constant 0 : index
    %c0_74 = arith.constant 0 : index
    %c0_75 = arith.constant 0 : index
    %155 = vector.load %arg20[%c0_73, %c0_74, %c0_75] : memref<2x1x128xf32, #tpu.memory_space<vmem>>, vector<1x1x128xf32>
    %156 = vector.shape_cast %155 : vector<1x1x128xf32> to vector<1x128xf32>
    %cst_76 = arith.constant dense<0.000000e+00> : vector<16xf32>
    %157 = vector.multi_reduction <add>, %152, %cst_76 [1] : vector<16x128xf32> to vector<16xf32>
    %158 = vector.shape_cast %157 : vector<16xf32> to vector<16x1xf32>
    %cst_77 = arith.constant 1.280000e+02 : f32
    %159 = vector.broadcast %cst_77 : f32 to vector<16x1xf32>
    %160 = arith.divf %158, %159 : vector<16x1xf32>
    %161 = vector.broadcast %160 : vector<16x1xf32> to vector<16x128xf32>
    %162 = arith.subf %152, %161 : vector<16x128xf32>
    %163 = arith.mulf %162, %162 : vector<16x128xf32>
    %cst_78 = arith.constant dense<0.000000e+00> : vector<16xf32>
    %164 = vector.multi_reduction <add>, %163, %cst_78 [1] : vector<16x128xf32> to vector<16xf32>
    %165 = vector.shape_cast %164 : vector<16xf32> to vector<16x1xf32>
    %cst_79 = arith.constant 1.280000e+02 : f32
    %166 = vector.broadcast %cst_79 : f32 to vector<16x1xf32>
    %167 = arith.divf %165, %166 : vector<16x1xf32>
    %168 = vector.broadcast %160 : vector<16x1xf32> to vector<16x128xf32>
    %169 = arith.subf %152, %168 : vector<16x128xf32>
    %cst_80 = arith.constant 9.99999996E-13 : f32
    %170 = vector.broadcast %cst_80 : f32 to vector<16x1xf32>
    %171 = arith.addf %167, %170 : vector<16x1xf32>
    %172 = math.rsqrt %171 : vector<16x1xf32>
    %173 = vector.broadcast %172 : vector<16x1xf32> to vector<16x128xf32>
    %174 = arith.mulf %169, %173 : vector<16x128xf32>
    %175 = vector.broadcast %154 : vector<1x128xf32> to vector<16x128xf32>
    %176 = arith.mulf %174, %175 : vector<16x128xf32>
    %177 = vector.broadcast %156 : vector<1x128xf32> to vector<16x128xf32>
    %178 = arith.addf %176, %177 : vector<16x128xf32>
    %179 = arith.truncf %178 : vector<16x128xf32> to vector<16x128xbf16>
    %c1 = arith.constant 1 : index
    %c0_81 = arith.constant 0 : index
    %c0_82 = arith.constant 0 : index
    %180 = vector.load %arg9[%c1, %c0_81, %c0_82] : memref<2x128x384xbf16, #tpu.memory_space<vmem>>, vector<1x128x384xbf16>
    %181 = vector.shape_cast %180 : vector<1x128x384xbf16> to vector<128x384xbf16>
    %cst_83 = arith.constant dense<0.000000e+00> : vector<16x384xf32>
    %182 = tpu.matmul %179, %181, %cst_83 {dimension_numbers = #tpu.dot_dimension_numbers<[1], [0], [0], [1], [0, 0, 1, 1], [], []>} : vector<16x128xbf16>, vector<128x384xbf16>, vector<16x384xf32> -> vector<16x384xf32>
    %c1_84 = arith.constant 1 : index
    %c0_85 = arith.constant 0 : index
    %c0_86 = arith.constant 0 : index
    %183 = vector.load %arg10[%c1_84, %c0_85, %c0_86] : memref<2x1x384xf32, #tpu.memory_space<vmem>>, vector<1x1x384xf32>
    %184 = vector.shape_cast %183 : vector<1x1x384xf32> to vector<1x384xf32>
    %185 = vector.broadcast %184 : vector<1x384xf32> to vector<16x384xf32>
    %186 = arith.addf %182, %185 : vector<16x384xf32>
    %187 = arith.truncf %186 : vector<16x384xf32> to vector<16x384xbf16>
    %188 = vector.extract_strided_slice %187 {offsets = [0, 0], sizes = [16, 64], strides = [1, 1]} : vector<16x384xbf16> to vector<16x64xbf16>
    %189 = vector.extract_strided_slice %187 {offsets = [0, 128], sizes = [16, 64], strides = [1, 1]} : vector<16x384xbf16> to vector<16x64xbf16>
    %190 = vector.extract_strided_slice %187 {offsets = [0, 256], sizes = [16, 64], strides = [1, 1]} : vector<16x384xbf16> to vector<16x64xbf16>
    %191 = tpu.transpose %189, [1, 0] : vector<16x64xbf16> -> vector<64x16xbf16>
    %cst_87 = arith.constant dense<0.000000e+00> : vector<16x16xf32>
    %192 = tpu.matmul %188, %191, %cst_87 {dimension_numbers = #tpu.dot_dimension_numbers<[1], [0], [0], [1], [0, 0, 1, 1], [], []>} : vector<16x64xbf16>, vector<64x16xbf16>, vector<16x16xf32> -> vector<16x16xf32>
    %193 = arith.addf %192, %41 : vector<16x16xf32>
    %cst_88 = arith.constant dense<0xFF800000> : vector<16xf32>
    %194 = vector.multi_reduction <maximumf>, %193, %cst_88 [1] : vector<16x16xf32> to vector<16xf32>
    %195 = vector.shape_cast %194 : vector<16xf32> to vector<16x1xf32>
    %196 = vector.broadcast %195 : vector<16x1xf32> to vector<16x16xf32>
    %197 = arith.subf %193, %196 : vector<16x16xf32>
    %198 = math.exp %197 : vector<16x16xf32>
    %cst_89 = arith.constant dense<0.000000e+00> : vector<16xf32>
    %199 = vector.multi_reduction <add>, %198, %cst_89 [1] : vector<16x16xf32> to vector<16xf32>
    %200 = vector.shape_cast %199 : vector<16xf32> to vector<16x1xf32>
    %201 = tpu.reciprocal %200 {approx = true} : vector<16x1xf32> -> vector<16x1xf32>
    %202 = vector.broadcast %201 : vector<16x1xf32> to vector<16x16xf32>
    %203 = arith.mulf %198, %202 : vector<16x16xf32>
    %204 = arith.truncf %203 : vector<16x16xf32> to vector<16x16xbf16>
    %cst_90 = arith.constant dense<0.000000e+00> : vector<16x64xf32>
    %205 = tpu.matmul %204, %190, %cst_90 {dimension_numbers = #tpu.dot_dimension_numbers<[1], [0], [0], [1], [0, 0, 1, 1], [], []>} : vector<16x16xbf16>, vector<16x64xbf16>, vector<16x64xf32> -> vector<16x64xf32>
    %206 = vector.extract_strided_slice %187 {offsets = [0, 64], sizes = [16, 64], strides = [1, 1]} : vector<16x384xbf16> to vector<16x64xbf16>
    %207 = vector.extract_strided_slice %187 {offsets = [0, 192], sizes = [16, 64], strides = [1, 1]} : vector<16x384xbf16> to vector<16x64xbf16>
    %208 = vector.extract_strided_slice %187 {offsets = [0, 320], sizes = [16, 64], strides = [1, 1]} : vector<16x384xbf16> to vector<16x64xbf16>
    %209 = tpu.transpose %207, [1, 0] : vector<16x64xbf16> -> vector<64x16xbf16>
    %cst_91 = arith.constant dense<0.000000e+00> : vector<16x16xf32>
    %210 = tpu.matmul %206, %209, %cst_91 {dimension_numbers = #tpu.dot_dimension_numbers<[1], [0], [0], [1], [0, 0, 1, 1], [], []>} : vector<16x64xbf16>, vector<64x16xbf16>, vector<16x16xf32> -> vector<16x16xf32>
    %211 = arith.addf %210, %41 : vector<16x16xf32>
    %cst_92 = arith.constant dense<0xFF800000> : vector<16xf32>
    %212 = vector.multi_reduction <maximumf>, %211, %cst_92 [1] : vector<16x16xf32> to vector<16xf32>
    %213 = vector.shape_cast %212 : vector<16xf32> to vector<16x1xf32>
    %214 = vector.broadcast %213 : vector<16x1xf32> to vector<16x16xf32>
    %215 = arith.subf %211, %214 : vector<16x16xf32>
    %216 = math.exp %215 : vector<16x16xf32>
    %cst_93 = arith.constant dense<0.000000e+00> : vector<16xf32>
    %217 = vector.multi_reduction <add>, %216, %cst_93 [1] : vector<16x16xf32> to vector<16xf32>
    %218 = vector.shape_cast %217 : vector<16xf32> to vector<16x1xf32>
    %219 = tpu.reciprocal %218 {approx = true} : vector<16x1xf32> -> vector<16x1xf32>
    %220 = vector.broadcast %219 : vector<16x1xf32> to vector<16x16xf32>
    %221 = arith.mulf %216, %220 : vector<16x16xf32>
    %222 = arith.truncf %221 : vector<16x16xf32> to vector<16x16xbf16>
    %cst_94 = arith.constant dense<0.000000e+00> : vector<16x64xf32>
    %223 = tpu.matmul %222, %208, %cst_94 {dimension_numbers = #tpu.dot_dimension_numbers<[1], [0], [0], [1], [0, 0, 1, 1], [], []>} : vector<16x16xbf16>, vector<16x64xbf16>, vector<16x64xf32> -> vector<16x64xf32>
    %224 = tpu.concatenate %205, %223 in 1 : vector<16x64xf32>, vector<16x64xf32> -> vector<16x128xf32>
    %225 = arith.truncf %224 : vector<16x128xf32> to vector<16x128xbf16>
    %c1_95 = arith.constant 1 : index
    %c0_96 = arith.constant 0 : index
    %c0_97 = arith.constant 0 : index
    %226 = vector.load %arg11[%c1_95, %c0_96, %c0_97] : memref<2x128x128xbf16, #tpu.memory_space<vmem>>, vector<1x128x128xbf16>
    %227 = vector.shape_cast %226 : vector<1x128x128xbf16> to vector<128x128xbf16>
    %cst_98 = arith.constant dense<0.000000e+00> : vector<16x128xf32>
    %228 = tpu.matmul %225, %227, %cst_98 {dimension_numbers = #tpu.dot_dimension_numbers<[1], [0], [0], [1], [0, 0, 1, 1], [], []>} : vector<16x128xbf16>, vector<128x128xbf16>, vector<16x128xf32> -> vector<16x128xf32>
    %c1_99 = arith.constant 1 : index
    %c0_100 = arith.constant 0 : index
    %c0_101 = arith.constant 0 : index
    %229 = vector.load %arg12[%c1_99, %c0_100, %c0_101] : memref<2x1x128xf32, #tpu.memory_space<vmem>>, vector<1x1x128xf32>
    %230 = vector.shape_cast %229 : vector<1x1x128xf32> to vector<1x128xf32>
    %231 = vector.broadcast %230 : vector<1x128xf32> to vector<16x128xf32>
    %232 = arith.addf %228, %231 : vector<16x128xf32>
    %233 = arith.addf %178, %232 : vector<16x128xf32>
    %c1_102 = arith.constant 1 : index
    %c0_103 = arith.constant 0 : index
    %c0_104 = arith.constant 0 : index
    %234 = vector.load %arg13[%c1_102, %c0_103, %c0_104] : memref<2x1x128xf32, #tpu.memory_space<vmem>>, vector<1x1x128xf32>
    %235 = vector.shape_cast %234 : vector<1x1x128xf32> to vector<1x128xf32>
    %c1_105 = arith.constant 1 : index
    %c0_106 = arith.constant 0 : index
    %c0_107 = arith.constant 0 : index
    %236 = vector.load %arg14[%c1_105, %c0_106, %c0_107] : memref<2x1x128xf32, #tpu.memory_space<vmem>>, vector<1x1x128xf32>
    %237 = vector.shape_cast %236 : vector<1x1x128xf32> to vector<1x128xf32>
    %cst_108 = arith.constant dense<0.000000e+00> : vector<16xf32>
    %238 = vector.multi_reduction <add>, %233, %cst_108 [1] : vector<16x128xf32> to vector<16xf32>
    %239 = vector.shape_cast %238 : vector<16xf32> to vector<16x1xf32>
    %cst_109 = arith.constant 1.280000e+02 : f32
    %240 = vector.broadcast %cst_109 : f32 to vector<16x1xf32>
    %241 = arith.divf %239, %240 : vector<16x1xf32>
    %242 = vector.broadcast %241 : vector<16x1xf32> to vector<16x128xf32>
    %243 = arith.subf %233, %242 : vector<16x128xf32>
    %244 = arith.mulf %243, %243 : vector<16x128xf32>
    %cst_110 = arith.constant dense<0.000000e+00> : vector<16xf32>
    %245 = vector.multi_reduction <add>, %244, %cst_110 [1] : vector<16x128xf32> to vector<16xf32>
    %246 = vector.shape_cast %245 : vector<16xf32> to vector<16x1xf32>
    %cst_111 = arith.constant 1.280000e+02 : f32
    %247 = vector.broadcast %cst_111 : f32 to vector<16x1xf32>
    %248 = arith.divf %246, %247 : vector<16x1xf32>
    %249 = vector.broadcast %241 : vector<16x1xf32> to vector<16x128xf32>
    %250 = arith.subf %233, %249 : vector<16x128xf32>
    %cst_112 = arith.constant 9.99999996E-13 : f32
    %251 = vector.broadcast %cst_112 : f32 to vector<16x1xf32>
    %252 = arith.addf %248, %251 : vector<16x1xf32>
    %253 = math.rsqrt %252 : vector<16x1xf32>
    %254 = vector.broadcast %253 : vector<16x1xf32> to vector<16x128xf32>
    %255 = arith.mulf %250, %254 : vector<16x128xf32>
    %256 = vector.broadcast %235 : vector<1x128xf32> to vector<16x128xf32>
    %257 = arith.mulf %255, %256 : vector<16x128xf32>
    %258 = vector.broadcast %237 : vector<1x128xf32> to vector<16x128xf32>
    %259 = arith.addf %257, %258 : vector<16x128xf32>
    %260 = arith.truncf %259 : vector<16x128xf32> to vector<16x128xbf16>
    %c1_113 = arith.constant 1 : index
    %c0_114 = arith.constant 0 : index
    %c0_115 = arith.constant 0 : index
    %261 = vector.load %arg15[%c1_113, %c0_114, %c0_115] : memref<2x128x256xbf16, #tpu.memory_space<vmem>>, vector<1x128x256xbf16>
    %262 = vector.shape_cast %261 : vector<1x128x256xbf16> to vector<128x256xbf16>
    %cst_116 = arith.constant dense<0.000000e+00> : vector<16x256xf32>
    %263 = tpu.matmul %260, %262, %cst_116 {dimension_numbers = #tpu.dot_dimension_numbers<[1], [0], [0], [1], [0, 0, 1, 1], [], []>} : vector<16x128xbf16>, vector<128x256xbf16>, vector<16x256xf32> -> vector<16x256xf32>
    %c1_117 = arith.constant 1 : index
    %c0_118 = arith.constant 0 : index
    %c0_119 = arith.constant 0 : index
    %264 = vector.load %arg16[%c1_117, %c0_118, %c0_119] : memref<2x1x256xf32, #tpu.memory_space<vmem>>, vector<1x1x256xf32>
    %265 = vector.shape_cast %264 : vector<1x1x256xf32> to vector<1x256xf32>
    %266 = vector.broadcast %265 : vector<1x256xf32> to vector<16x256xf32>
    %267 = arith.addf %263, %266 : vector<16x256xf32>
    %268 = arith.mulf %267, %267 : vector<16x256xf32>
    %269 = arith.mulf %267, %268 : vector<16x256xf32>
    %cst_120 = arith.constant 4.471500e-02 : f32
    %270 = vector.broadcast %cst_120 : f32 to vector<16x256xf32>
    %271 = arith.mulf %270, %269 : vector<16x256xf32>
    %272 = arith.addf %267, %271 : vector<16x256xf32>
    %cst_121 = arith.constant 0.797884583 : f32
    %273 = vector.broadcast %cst_121 : f32 to vector<16x256xf32>
    %274 = arith.mulf %273, %272 : vector<16x256xf32>
    %275 = math.tanh %274 : vector<16x256xf32>
    %cst_122 = arith.constant 1.000000e+00 : f32
    %276 = vector.broadcast %cst_122 : f32 to vector<16x256xf32>
    %277 = arith.addf %276, %275 : vector<16x256xf32>
    %cst_123 = arith.constant 5.000000e-01 : f32
    %278 = vector.broadcast %cst_123 : f32 to vector<16x256xf32>
    %279 = arith.mulf %278, %277 : vector<16x256xf32>
    %280 = arith.mulf %267, %279 : vector<16x256xf32>
    %281 = arith.truncf %280 : vector<16x256xf32> to vector<16x256xbf16>
    %c1_124 = arith.constant 1 : index
    %c0_125 = arith.constant 0 : index
    %c0_126 = arith.constant 0 : index
    %282 = vector.load %arg17[%c1_124, %c0_125, %c0_126] : memref<2x256x128xbf16, #tpu.memory_space<vmem>>, vector<1x256x128xbf16>
    %283 = vector.shape_cast %282 : vector<1x256x128xbf16> to vector<256x128xbf16>
    %cst_127 = arith.constant dense<0.000000e+00> : vector<16x128xf32>
    %284 = tpu.matmul %281, %283, %cst_127 {dimension_numbers = #tpu.dot_dimension_numbers<[1], [0], [0], [1], [0, 0, 1, 1], [], []>} : vector<16x256xbf16>, vector<256x128xbf16>, vector<16x128xf32> -> vector<16x128xf32>
    %c1_128 = arith.constant 1 : index
    %c0_129 = arith.constant 0 : index
    %c0_130 = arith.constant 0 : index
    %285 = vector.load %arg18[%c1_128, %c0_129, %c0_130] : memref<2x1x128xf32, #tpu.memory_space<vmem>>, vector<1x1x128xf32>
    %286 = vector.shape_cast %285 : vector<1x1x128xf32> to vector<1x128xf32>
    %287 = vector.broadcast %286 : vector<1x128xf32> to vector<16x128xf32>
    %288 = arith.addf %284, %287 : vector<16x128xf32>
    %289 = arith.addf %259, %288 : vector<16x128xf32>
    %c1_131 = arith.constant 1 : index
    %c0_132 = arith.constant 0 : index
    %c0_133 = arith.constant 0 : index
    %290 = vector.load %arg19[%c1_131, %c0_132, %c0_133] : memref<2x1x128xf32, #tpu.memory_space<vmem>>, vector<1x1x128xf32>
    %291 = vector.shape_cast %290 : vector<1x1x128xf32> to vector<1x128xf32>
    %c1_134 = arith.constant 1 : index
    %c0_135 = arith.constant 0 : index
    %c0_136 = arith.constant 0 : index
    %292 = vector.load %arg20[%c1_134, %c0_135, %c0_136] : memref<2x1x128xf32, #tpu.memory_space<vmem>>, vector<1x1x128xf32>
    %293 = vector.shape_cast %292 : vector<1x1x128xf32> to vector<1x128xf32>
    %cst_137 = arith.constant dense<0.000000e+00> : vector<16xf32>
    %294 = vector.multi_reduction <add>, %289, %cst_137 [1] : vector<16x128xf32> to vector<16xf32>
    %295 = vector.shape_cast %294 : vector<16xf32> to vector<16x1xf32>
    %cst_138 = arith.constant 1.280000e+02 : f32
    %296 = vector.broadcast %cst_138 : f32 to vector<16x1xf32>
    %297 = arith.divf %295, %296 : vector<16x1xf32>
    %298 = vector.broadcast %297 : vector<16x1xf32> to vector<16x128xf32>
    %299 = arith.subf %289, %298 : vector<16x128xf32>
    %300 = arith.mulf %299, %299 : vector<16x128xf32>
    %cst_139 = arith.constant dense<0.000000e+00> : vector<16xf32>
    %301 = vector.multi_reduction <add>, %300, %cst_139 [1] : vector<16x128xf32> to vector<16xf32>
    %302 = vector.shape_cast %301 : vector<16xf32> to vector<16x1xf32>
    %cst_140 = arith.constant 1.280000e+02 : f32
    %303 = vector.broadcast %cst_140 : f32 to vector<16x1xf32>
    %304 = arith.divf %302, %303 : vector<16x1xf32>
    %305 = vector.broadcast %297 : vector<16x1xf32> to vector<16x128xf32>
    %306 = arith.subf %289, %305 : vector<16x128xf32>
    %cst_141 = arith.constant 9.99999996E-13 : f32
    %307 = vector.broadcast %cst_141 : f32 to vector<16x1xf32>
    %308 = arith.addf %304, %307 : vector<16x1xf32>
    %309 = math.rsqrt %308 : vector<16x1xf32>
    %310 = vector.broadcast %309 : vector<16x1xf32> to vector<16x128xf32>
    %311 = arith.mulf %306, %310 : vector<16x128xf32>
    %312 = vector.broadcast %291 : vector<1x128xf32> to vector<16x128xf32>
    %313 = arith.mulf %311, %312 : vector<16x128xf32>
    %314 = vector.broadcast %293 : vector<1x128xf32> to vector<16x128xf32>
    %315 = arith.addf %313, %314 : vector<16x128xf32>
    %c0_142 = arith.constant 0 : index
    %c0_143 = arith.constant 0 : index
    %316 = vector.load %arg3[%c0_142, %c0_143] : memref<16x1xf32, #tpu.memory_space<vmem>>, vector<16x1xf32>
    %317 = vector.broadcast %316 : vector<16x1xf32> to vector<16x128xf32>
    %318 = arith.mulf %315, %317 : vector<16x128xf32>
    %319 = arith.truncf %318 : vector<16x128xf32> to vector<16x128xbf16>
    %c0_144 = arith.constant 0 : index
    %c0_145 = arith.constant 0 : index
    %320 = vector.load %arg21[%c0_144, %c0_145] : memref<128x128xbf16, #tpu.memory_space<vmem>>, vector<128x128xbf16>
    %cst_146 = arith.constant dense<0.000000e+00> : vector<16x128xf32>
    %321 = tpu.matmul %319, %320, %cst_146 {dimension_numbers = #tpu.dot_dimension_numbers<[1], [0], [0], [1], [0, 0, 1, 1], [], []>} : vector<16x128xbf16>, vector<128x128xbf16>, vector<16x128xf32> -> vector<16x128xf32>
    %c0_147 = arith.constant 0 : index
    %c0_148 = arith.constant 0 : index
    %322 = vector.load %arg22[%c0_147, %c0_148] : memref<1x128xf32, #tpu.memory_space<vmem>>, vector<1x128xf32>
    %323 = vector.broadcast %322 : vector<1x128xf32> to vector<16x128xf32>
    %324 = arith.addf %321, %323 : vector<16x128xf32>
    %c0_149 = arith.constant 0 : index
    %c0_150 = arith.constant 0 : index
    %325 = vector.load %arg23[%c0_149, %c0_150] : memref<16x128xf32, #tpu.memory_space<vmem>>, vector<16x128xf32>
    tpu.vector_store %arg23[%c0_149, %c0_150], %324 {strides = array<i32>} : memref<16x128xf32, #tpu.memory_space<vmem>>, vector<16x128xf32>,
    return
  }
  func.func @transform_0(%arg0: i32) -> (i32, i32) {
    %c0_i32 = arith.constant 0 : i32
    %c0_i32_0 = arith.constant 0 : i32
    %c0_i32_1 = arith.constant 0 : i32
    return %c0_i32, %c0_i32_0 : i32, i32
  }
  func.func @transform_1(%arg0: i32) -> (i32, i32) {
    %c0_i32 = arith.constant 0 : i32
    %c0_i32_0 = arith.constant 0 : i32
    %c0_i32_1 = arith.constant 0 : i32
    return %c0_i32, %c0_i32_0 : i32, i32
  }
  func.func @transform_2(%arg0: i32) -> (i32, i32) {
    %c0_i32 = arith.constant 0 : i32
    %c0_i32_0 = arith.constant 0 : i32
    %c0_i32_1 = arith.constant 0 : i32
    return %c0_i32, %c0_i32_0 : i32, i32
  }
  func.func @transform_3(%arg0: i32) -> (i32, i32) {
    %c0_i32 = arith.constant 0 : i32
    %c0_i32_0 = arith.constant 0 : i32
    %c0_i32_1 = arith.constant 0 : i32
    return %c0_i32, %c0_i32_0 : i32, i32
  }
  func.func @transform_4(%arg0: i32) -> (i32, i32) {
    %c0_i32 = arith.constant 0 : i32
    %c0_i32_0 = arith.constant 0 : i32
    %c0_i32_1 = arith.constant 0 : i32
    return %c0_i32, %c0_i32_0 : i32, i32
  }
  func.func @transform_5(%arg0: i32) -> (i32, i32) {
    %c0_i32 = arith.constant 0 : i32
    %c0_i32_0 = arith.constant 0 : i32
    %c0_i32_1 = arith.constant 0 : i32
    return %c0_i32, %c0_i32_0 : i32, i32
  }
  func.func @transform_6(%arg0: i32) -> (i32, i32) {
    %c0_i32 = arith.constant 0 : i32
    %c0_i32_0 = arith.constant 0 : i32
    %c0_i32_1 = arith.constant 0 : i32
    return %c0_i32, %c0_i32_0 : i32, i32
  }
  func.func @transform_7(%arg0: i32) -> (i32, i32) {
    %c0_i32 = arith.constant 0 : i32
    %c0_i32_0 = arith.constant 0 : i32
    %c0_i32_1 = arith.constant 0 : i32
    return %c0_i32, %c0_i32_0 : i32, i32
  }
  func.func @transform_8(%arg0: i32) -> (i32, i32, i32) {
    %c0_i32 = arith.constant 0 : i32
    %c0_i32_0 = arith.constant 0 : i32
    %c0_i32_1 = arith.constant 0 : i32
    %c0_i32_2 = arith.constant 0 : i32
    return %c0_i32, %c0_i32_0, %c0_i32_1 : i32, i32, i32
  }
  func.func @transform_9(%arg0: i32) -> (i32, i32, i32) {
    %c0_i32 = arith.constant 0 : i32
    %c0_i32_0 = arith.constant 0 : i32
    %c0_i32_1 = arith.constant 0 : i32
    %c0_i32_2 = arith.constant 0 : i32
    return %c0_i32, %c0_i32_0, %c0_i32_1 : i32, i32, i32
  }
  func.func @transform_10(%arg0: i32) -> (i32, i32, i32) {
    %c0_i32 = arith.constant 0 : i32
    %c0_i32_0 = arith.constant 0 : i32
    %c0_i32_1 = arith.constant 0 : i32
    %c0_i32_2 = arith.constant 0 : i32
    return %c0_i32, %c0_i32_0, %c0_i32_1 : i32, i32, i32
  }
  func.func @transform_11(%arg0: i32) -> (i32, i32, i32) {
    %c0_i32 = arith.constant 0 : i32
    %c0_i32_0 = arith.constant 0 : i32
    %c0_i32_1 = arith.constant 0 : i32
    %c0_i32_2 = arith.constant 0 : i32
    return %c0_i32, %c0_i32_0, %c0_i32_1 : i32, i32, i32
  }
  func.func @transform_12(%arg0: i32) -> (i32, i32, i32) {
    %c0_i32 = arith.constant 0 : i32
    %c0_i32_0 = arith.constant 0 : i32
    %c0_i32_1 = arith.constant 0 : i32
    %c0_i32_2 = arith.constant 0 : i32
    return %c0_i32, %c0_i32_0, %c0_i32_1 : i32, i32, i32
  }
  func.func @transform_13(%arg0: i32) -> (i32, i32, i32) {
    %c0_i32 = arith.constant 0 : i32
    %c0_i32_0 = arith.constant 0 : i32
    %c0_i32_1 = arith.constant 0 : i32
    %c0_i32_2 = arith.constant 0 : i32
    return %c0_i32, %c0_i32_0, %c0_i32_1 : i32, i32, i32
  }
  func.func @transform_14(%arg0: i32) -> (i32, i32, i32) {
    %c0_i32 = arith.constant 0 : i32
    %c0_i32_0 = arith.constant 0 : i32
    %c0_i32_1 = arith.constant 0 : i32
    %c0_i32_2 = arith.constant 0 : i32
    return %c0_i32, %c0_i32_0, %c0_i32_1 : i32, i32, i32
  }
  func.func @transform_15(%arg0: i32) -> (i32, i32, i32) {
    %c0_i32 = arith.constant 0 : i32
    %c0_i32_0 = arith.constant 0 : i32
    %c0_i32_1 = arith.constant 0 : i32
    %c0_i32_2 = arith.constant 0 : i32
    return %c0_i32, %c0_i32_0, %c0_i32_1 : i32, i32, i32
  }
  func.func @transform_16(%arg0: i32) -> (i32, i32, i32) {
    %c0_i32 = arith.constant 0 : i32
    %c0_i32_0 = arith.constant 0 : i32
    %c0_i32_1 = arith.constant 0 : i32
    %c0_i32_2 = arith.constant 0 : i32
    return %c0_i32, %c0_i32_0, %c0_i32_1 : i32, i32, i32
  }
  func.func @transform_17(%arg0: i32) -> (i32, i32, i32) {
    %c0_i32 = arith.constant 0 : i32
    %c0_i32_0 = arith.constant 0 : i32
    %c0_i32_1 = arith.constant 0 : i32
    %c0_i32_2 = arith.constant 0 : i32
    return %c0_i32, %c0_i32_0, %c0_i32_1 : i32, i32, i32
  }
  func.func @transform_18(%arg0: i32) -> (i32, i32, i32) {
    %c0_i32 = arith.constant 0 : i32
    %c0_i32_0 = arith.constant 0 : i32
    %c0_i32_1 = arith.constant 0 : i32
    %c0_i32_2 = arith.constant 0 : i32
    return %c0_i32, %c0_i32_0, %c0_i32_1 : i32, i32, i32
  }
  func.func @transform_19(%arg0: i32) -> (i32, i32, i32) {
    %c0_i32 = arith.constant 0 : i32
    %c0_i32_0 = arith.constant 0 : i32
    %c0_i32_1 = arith.constant 0 : i32
    %c0_i32_2 = arith.constant 0 : i32
    return %c0_i32, %c0_i32_0, %c0_i32_1 : i32, i32, i32
  }
  func.func @transform_20(%arg0: i32) -> (i32, i32) {
    %c0_i32 = arith.constant 0 : i32
    %c0_i32_0 = arith.constant 0 : i32
    %c0_i32_1 = arith.constant 0 : i32
    return %c0_i32, %c0_i32_0 : i32, i32
  }
  func.func @transform_21(%arg0: i32) -> (i32, i32) {
    %c0_i32 = arith.constant 0 : i32
    %c0_i32_0 = arith.constant 0 : i32
    %c0_i32_1 = arith.constant 0 : i32
    return %c0_i32, %c0_i32_0 : i32, i32
  }
  func.func @transform_22(%arg0: i32) -> (i32, i32) {
    %c0_i32 = arith.constant 0 : i32
    %c0_i32_0 = arith.constant 0 : i32
    %c0_i32_1 = arith.constant 0 : i32
    return %c0_i32, %c0_i32_0 : i32, i32
  }
}

</mosaic_0001>

<bundles_post_ra>
// kernel: tpu_custom_call.1
= control target key start
LH: loop header
LB: loop body
LE: loop exit
PB: predicated region body
PF: predicated region fallthrough
CT: control target
= control target key end

     0   :  { %s3674_s0 = inlined_call_operand.vmem [shape: s32[16,1], index: 0, kind: input, shape index: {}]   ;;  %s3675_s1 = inlined_call_operand.vmem [shape: s32[16,1], index: 1, kind: input, shape index: {}]   ;;  %s3676_s2 = inlined_call_operand.vmem [shape: f32[16,1], index: 2, kind: input, shape index: {}]   ;;  %s3677_s3 = inlined_call_operand.vmem [shape: f32[16,16], index: 3, kind: input, shape index: {}]   ;;  %s3678_s4 = inlined_call_operand.hbm [shape: f32[64,128], index: 4, kind: input, shape index: {}]   ;;  %s3679_s5 = inlined_call_operand.vmem [shape: f32[16,128], index: 5, kind: input, shape index: {}]   ;;  %s3680_s6 = inlined_call_operand.hbm [shape: f32[1,128], index: 6, kind: input, shape index: {}]   ;;  %s3681_s7 = inlined_call_operand.vmem [shape: f32[1,128], index: 7, kind: input, shape index: {}]   ;;  %s3682_s8 = inlined_call_operand.hbm [shape: bf16[2,128,384], index: 8, kind: input, shape index: {}]   ;;  %s3683_s9 = inlined_call_operand.vmem [shape: f32[2,1,384], index: 9, kind: input, shape index: {}]   ;;  %s3684_s10 = inlined_call_operand.hbm [shape: bf16[2,128,128], index: 10, kind: input, shape index: {}]   ;;  %s3685_s11 = inlined_call_operand.vmem [shape: f32[2,1,128], index: 11, kind: input, shape index: {}]   ;;  %s3686_s12 = inlined_call_operand.vmem [shape: f32[2,1,128], index: 12, kind: input, shape index: {}]   ;;  %s3687_s13 = inlined_call_operand.vmem [shape: f32[2,1,128], index: 13, kind: input, shape index: {}]   ;;  %s3688_s14 = inlined_call_operand.hbm [shape: bf16[2,128,256], index: 14, kind: input, shape index: {}]   ;;  %s3689_s15 = inlined_call_operand.vmem [shape: f32[2,1,256], index: 15, kind: input, shape index: {}]   ;;  %s3690_s16 = inlined_call_operand.hbm [shape: bf16[2,256,128], index: 16, kind: input, shape index: {}]   ;;  %s3691_s17 = inlined_call_operand.vmem [shape: f32[2,1,128], index: 17, kind: input, shape index: {}]   ;;  %s3692_s18 = inlined_call_operand.vmem [shape: f32[2,1,128], index: 18, kind: input, shape index: {}]   ;;  %s3693_s19 = inlined_call_operand.vmem [shape: f32[2,1,128], index: 19, kind: input, shape index: {}]   ;;  %s3694_s20 = inlined_call_operand.hbm [shape: bf16[128,128], index: 20, kind: input, shape index: {}]   ;;  %s3695_s21 = inlined_call_operand.vmem [shape: f32[1,128], index: 21, kind: input, shape index: {}]   ;;  %s3696_s22 = inlined_call_operand.hbm [shape: f32[16,128], index: 22, kind: output, shape index: {}]  }
   0x1   :  { %3705 = sst [smem:[#allocation20_spill]] %s3674_s0 }
   0x2   :  { %3706 = sst [smem:[#allocation21_spill]] %s3675_s1 }
   0x3   :  { %3707 = sst [smem:[#allocation22_spill]] %s3676_s2 }
   0x4   :  { %3708 = sst [smem:[#allocation23_spill]] %s3677_s3 }
   0x5   :  { %3709 = sst [smem:[#allocation24_spill]] %s3678_s4 }
   0x6   :  { %3710 = sst [smem:[#allocation25_spill]] %s3679_s5 }
   0x7   :  { %3711 = sst [smem:[#allocation26_spill]] %s3680_s6 }
   0x8   :  { %27 = vsyncpa [#allocation3], 0 }
   0x9   :  { %28 = vsyncpa [#allocation6], 0 }
   0xa   :  { %29 = vsyncpa [#allocation9], 0 }
   0xb   :  { %30 = vsyncpa [#allocation12], 0  ;;  %s3712_s29 = sld [smem:[#allocation26_spill]] }
  0x11   :  { %s60_s30 = sshll.u32 %s3712_s29, 4  ;;  %s61_s30 = int_to_ptr.hbm [resolvable:$true] %s60_s30 }
  0x12   :  { %31 = vsyncpa [#allocation4], 0  ;;  %s3266_s4 = smov [#allocation5]   ;;  %s87_s5 = sshll.u32 %s3684_s10, 4  ;;  %s88_s5 = int_to_ptr.hbm [resolvable:$true] %s87_s5 }
  0x13   :  { %s62_s0 = sshll.u32 %s3266_s4, 4  ;;  %s3267_s24 = smov [#allocation8]   ;;  %s63_s0 = int_to_ptr.vmem [resolvable:$true] %s62_s0 }
  0x14   :  { %65 = dma.hbm_to_vmem [thread:$0]  %s61_s30, 16, %s63_s0, [#allocation6]  }
  0x15   :  { %s89_s6 = sshll.u32 %s3267_s24, 4  ;;  %s3702_s25 = smov 64   ;;  %s90_s6 = int_to_ptr.vmem [resolvable:$true] %s89_s6 }
  0x16   :  { %s3704_s26 = smov 4   ;;  %s121_s3 = sshll.u32 %s3690_s16, 4  ;;  %s122_s3 = int_to_ptr.hbm [resolvable:$true] %s121_s3 }
  0x17   :  { %95 = dma.hbm_to_vmem [thread:$0]  %s88_s5, 2048, %s90_s6, [#allocation9], %s3702_s25, %s3702_s25, %s3704_s26  }
  0x18   :  { %s3270_s28 = smov [#allocation11]   ;;  %s3713_s4 = sld [smem:[#allocation24_spill]] }
  0x19   :  { %s123_s29 = sshll.u32 %s3270_s28, 4  ;;  %s3271_s23 = smov [#allocation2]   ;;  %s124_s29 = int_to_ptr.vmem [resolvable:$true] %s123_s29 }
  0x1a   :  { %129 = dma.hbm_to_vmem [thread:$0]  %s122_s3, 4096, %s124_s29, [#allocation12], %s3702_s25, %s3702_s25, %s3704_s26  }
  0x1b   :  { %s46_s1 = sshll.u32 %s3271_s23, 4  ;;  %s3272_s5 = smov 128   ;;  %s47_s1 = int_to_ptr.vmem [resolvable:$true] %s46_s1 }
  0x1c   :  { %s3273_s24 = smov 8   ;;  %s72_s2 = sshll.u32 %s3682_s8, 4  ;;  %s73_s2 = int_to_ptr.hbm [resolvable:$true] %s72_s2 }
  0x1d   :  { %s3274_s27 = smov [#allocation7]   ;;  %s106_s29 = sshll.u32 %s3688_s14, 4  ;;  %s107_s29 = int_to_ptr.hbm [resolvable:$true] %s106_s29 }
  0x1e   :  { %s44_s0 = sshll.u32 %s3713_s4, 4  ;;  %s74_s28 = sshll.u32 %s3274_s27, 4  ;;  %s45_s0 = int_to_ptr.hbm [resolvable:$true] %s44_s0  ;;  %s75_s28 = int_to_ptr.vmem [resolvable:$true] %s74_s28 }
  0x1f   :  { %52 = dma.hbm_to_vmem [thread:$0]  %s45_s0, 1024, %s47_s1, [#allocation3], %s3272_s5, %s3272_s5, %s3273_s24  }
  0x20   :  { %s3275_s30 = smov 192   ;;  %s3276_s4 = smov 12  }
  0x21   :  { %80 = dma.hbm_to_vmem [thread:$0]  %s73_s2, 6144, %s75_s28, [#allocation6], %s3275_s30, %s3275_s30, %s3276_s4  }
  0x22   :  { %s3277_s23 = smov [#allocation10]   ;;  %s140_s1 = sshll.u32 %s3694_s20, 4  ;;  %s141_s1 = int_to_ptr.hbm [resolvable:$true] %s140_s1 }
  0x23   :  { %s108_s25 = sshll.u32 %s3277_s23, 4  ;;  %s3278_s8 = smov [#allocation13]   ;;  %s109_s25 = int_to_ptr.vmem [resolvable:$true] %s108_s25 }
  0x24   :  { %114 = dma.hbm_to_vmem [thread:$0]  %s107_s29, 4096, %s109_s25, [#allocation9], %s3272_s5, %s3272_s5, %s3273_s24  }
  0x25   :  { %s142_s16 = sshll.u32 %s3278_s8, 4  ;;  %s3714_s14 = smov 4   ;;  %s143_s16 = int_to_ptr.vmem [resolvable:$true] %s142_s16 }
  0x26   :  { %s3715_s6 = smov 64  }
  0x27   :  { %148 = dma.hbm_to_vmem [thread:$0]  %s141_s1, 1024, %s143_s16, [#allocation12], %s3715_s6, %s3715_s6, %s3714_s14  }
  0x28   :  { %3256 = dma.done.wait [#allocation3], 1024  }
  0x29   :  { %3257 = vsyncadd [#allocation3], 4294966272 }
  0x2a   :  { %3258 = dma.done.wait [#allocation6], 6160  }
  0x2b   :  { %3259 = vsyncadd [#allocation6], 4294961136 }
  0x2c   :  { %3260 = dma.done.wait [#allocation9], 6144  }
  0x2d   :  { %3261 = vsyncadd [#allocation9], 4294961152 }
  0x2e   :  { %3262 = dma.done.wait [#allocation12], 5120  }
  0x2f   :  { %3263 = vsyncadd [#allocation12], 4294962176  ;;  %v3279_v0 = vmov 0   ;;  %s3716_s26 = sld [smem:[#allocation20_spill]]  ;;  %v217_v3 = vld [vmem:[#allocation2 + $0x38] sm:$0xff]  ;;  %v216_v4 = vld [vmem:[#allocation2 + $0x30] sm:$0xff]  ;;  %v182_v15 = vlaneseq }
  0x30   :  { %2968 = vset.pattern.permute.xlu1 %v3279_v0  ;;  %2967 = vset.pattern.permute.xlu0 %v3279_v0  ;;  %v215_v5 = vld [vmem:[#allocation2 + $0x28] sm:$0xff]  ;;  %v214_v6 = vld [vmem:[#allocation2 + $0x20] sm:$0xff]  ;;  %s3717_s3 = sld [smem:[#allocation21_spill]]  ;;  %v213_v9 = vld [vmem:[#allocation2 + $0x18] sm:$0xff]  ;;  %vm250_vm0 = vcmask 523264   ;;  %v3280_v19 = vmov 0.0  }
  0x31   :  { %265 = vmatpush.msra.mxu2 %v217_v3  ;;  %v212_v10 = vld [vmem:[#allocation2 + $0x10] sm:$0xff]  ;;  %v211_v11 = vld [vmem:[#allocation2 + $0x8] sm:$0xff]  ;;  %v210_v12 = vld [vmem:[#allocation2] sm:$0xff]  ;;  %s3718_s0 = sld [smem:[#allocation25_spill]]  ;;  %v183_v16 = vand.u32 127, %v182_v15  ;;  %vm220_vm3 = vcmask 130048  }
  0x32   :  { %v3281_v32 = vmov 128.0   ;;  %v2340_v47 = vld [vmem:[#allocation7 + $0xa8] sm:$0xf]  ;;  %v2836_v48 = vld [vmem:[#allocation7 + $0xb0] sm:$0xf0]  ;;  %s3719_s2 = sld [smem:[#allocation23_spill]] }
  0x33   :  { %266 = vmatpush.msra.mxu2 %v216_v4  ;;  %2994 = vrcp.f32 %v3281_v32  ;;  %v2835_v49 = vld [vmem:[#allocation7 + $0xac] sm:$0xf]  ;;  %v2341_v50 = vor.u32 %v2836_v48, %v2340_v47  ;;  %v2342_v51 = vld [vmem:[#allocation7 + $0xb4] sm:$0xf0]  ;;  %v2348_v52 = vld [vmem:[#allocation7 + $0xb0] sm:$0xf] }
  0x34   :  { %v2837_v53 = vld [vmem:[#allocation7 + $0xb8] sm:$0xf0]  ;;  %v2345_v54 = vor.u32 %v2835_v49, %v2342_v51  ;;  %v2328_v56 = vld [vmem:[#allocation7 + $0x90] sm:$0xf]  ;;  %v2832_v58 = vld [vmem:[#allocation7 + $0x94] sm:$0xf] }
  0x35   :  { %v181_v1 = vld [vmem:[%s3716_s26 + $0x8] sm:$0xff]  ;;  %v180_v2 = vld [vmem:[%s3716_s26] sm:$0xff]  ;;  %267 = vmatpush.msra.mxu2 %v215_v5  ;;  %v2349_v55 = vor.u32 %v2837_v53, %v2348_v52  ;;  %v2336_v61 = vld [vmem:[#allocation7 + $0x98] sm:$0xf]  ;;  %s3720_s30 = sld [smem:[#allocation22_spill]]  ;;  %s3282_s20 = smov [#allocation14]  }
  0x36   :  { %188 = vperm.xlu1 %2968, %v181_v1   ;;  %185 = vperm.xlu0 %2967, %v180_v2   ;;  %v197_v7 = vld [vmem:[%s3717_s3 + $0x8] sm:$0xff]  ;;  %v196_v8 = vld [vmem:[%s3717_s3] sm:$0xff]  ;;  %v2316_v1 = vld [vmem:[#allocation7 + $0x78] sm:$0xf]  ;;  %s2230_s26 = sshll.u32 %s3696_s22, 4  ;;  %s2231_s26 = int_to_ptr.hbm [resolvable:$true] %s2230_s26 }
  0x37   :  { %268 = vmatpush.msra.mxu2 %v214_v6  ;;  %v219_v13 = vld [vmem:[%s3718_s0 + $0x8] sm:$0xff]  ;;  %v218_v14 = vld [vmem:[%s3718_s0] sm:$0xff]  ;;  %538 = vmatpush.bf16.msra.mxu0 %v2349_v55 }
  0x38   :  { %241 = vmatpush.msra.mxu3 %v219_v13  ;;  %v2833_v57 = vld [vmem:[#allocation7 + $0x98] sm:$0xf0]  ;;  %v2330_v60 = vld [vmem:[#allocation7 + $0x9c] sm:$0xf0]  ;;  %v2834_v62 = vld [vmem:[#allocation7 + $0xa0] sm:$0xf0] }
  0x39   :  { %269 = vmatpush.msra.mxu2 %v213_v9  ;;  %v2995_v33 = vpop.eup %2994  ;;  %v2329_v59 = vor.u32 %v2833_v57, %v2328_v56  ;;  %v2333_v63 = vor.u32 %v2832_v58, %v2330_v60  ;;  %v2337_v0 = vor.u32 %v2834_v62, %v2336_v61  ;;  %v2830_v2 = vld [vmem:[#allocation7 + $0x80] sm:$0xf0]  ;;  %v2829_v3 = vld [vmem:[#allocation7 + $0x7c] sm:$0xf]  ;;  %v2318_v5 = vld [vmem:[#allocation7 + $0x84] sm:$0xf0] }
  0x3a   :  { %242 = vmatpush.msra.mxu3 %v218_v14  ;;  %v287_v34 = vmul.f32 128.0, %v2995_v33  ;;  %vm291_vm6 = vweird.f32 %v2995_v33  ;;  %v2317_v4 = vor.u32 %v2830_v2, %v2316_v1  ;;  %v2324_v6 = vld [vmem:[#allocation7 + $0x80] sm:$0xf]  ;;  %v2306_v14 = vld [vmem:[#allocation7 + $0x6c] sm:$0xf0] }
  0x3b   :  { %270 = vmatpush.msra.mxu2 %v212_v10  ;;  %539 = vmatpush.bf16.msra.mxu0 %v2337_v0  ;;  %v2304_v10 = vld [vmem:[#allocation7 + $0x60] sm:$0xf]  ;;  %v2312_v15 = vld [vmem:[#allocation7 + $0x68] sm:$0xf]  ;;  %v2814_v51 = vld [vmem:[#allocation7 + $0x4] sm:$0xf] }
  0x3c   :  { %v288_v35 = vsub.f32 1.0, %v287_v34  ;;  %524 = vmatpush.bf16.msrb.mxu3 %v2345_v54  ;;  %v2282_v32 = vld [vmem:[#allocation7 + $0x3c] sm:$0xf0]  ;;  %v2822_v34 = vld [vmem:[#allocation7 + $0x40] sm:$0xf0] }
  0x3d   :  { %271 = vmatpush.msra.mxu2 %v211_v11  ;;  %v2827_v11 = vld [vmem:[#allocation7 + $0x68] sm:$0xf0]  ;;  %v2256_v49 = vld [vmem:[#allocation7] sm:$0xf]  ;;  %v2258_v54 = vld [vmem:[#allocation7 + $0xc] sm:$0xf0] }
  0x3e   :  { %202 = vperm.xlu1 %2968, %v197_v7   ;;  %199 = vperm.xlu0 %2967, %v196_v8   ;;  %v289_v36 = vmul.f32 %v2995_v33, %v288_v35  ;;  %v2831_v7 = vld [vmem:[#allocation7 + $0x88] sm:$0xf0]  ;;  %v2321_v8 = vor.u32 %v2829_v3, %v2318_v5  ;;  %v2305_v13 = vor.u32 %v2827_v11, %v2304_v10  ;;  %v2264_v55 = vld [vmem:[#allocation7 + $0x8] sm:$0xf]  ;;  %v2816_v56 = vld [vmem:[#allocation7 + $0x10] sm:$0xf0] }
  0x3f   :  { %272 = vmatpush.msra.mxu2 %v210_v12  ;;  %v2325_v9 = vor.u32 %v2831_v7, %v2324_v6  ;;  %v2826_v12 = vld [vmem:[#allocation7 + $0x64] sm:$0xf]  ;;  %v2261_v58 = vor.u32 %v2814_v51, %v2258_v54 }
  0x40   :  { %v290_v37 = vadd.f32 %v2995_v33, %v289_v36  ;;  %525 = vmatpush.bf16.msrb.mxu3 %v2333_v63 }
  0x41   :  { %510 = vmatpush.bf16.msrb.mxu2 %v2341_v50  ;;  %540 = vmatpush.bf16.msra.mxu0 %v2325_v9  ;;  %v2815_v50 = vld [vmem:[#allocation7 + $0x8] sm:$0xf0] }
  0x42   :  { %v3456_v38 = vsel %vm291_vm6, %v2995_v33, %v290_v37  ;;  %v2288_v33 = vld [vmem:[#allocation7 + $0x38] sm:$0xf]  ;;  %v2257_v53 = vor.u32 %v2815_v50, %v2256_v49 }
  0x43   :  { %v2289_v36 = vor.u32 %v2822_v34, %v2288_v33  ;;  %v2268_v37 = vld [vmem:[#allocation7 + $0x18] sm:$0xf] }
  0x44   :  { %526 = vmatpush.bf16.msrb.mxu3 %v2321_v8 }
  0x45   :  { %511 = vmatpush.bf16.msrb.mxu2 %v2329_v59  ;;  %v2265_v59 = vor.u32 %v2816_v56, %v2264_v55 }
  0x49   :  { %512 = vmatpush.bf16.msrb.mxu2 %v2317_v4 }
  0x4d   :  { %513 = vmatpush.bf16.msrb.mxu2 %v2305_v13  ;;  %v2979_v13 = vld [vmem:[#allocation5] ss:$0 sm:$0xff] }
  0xa8   :  { %v186_v17 = vpop.permute.xlu0 %185  ;;  %v189_v18 = vpop.permute.xlu1 %188 }
  0xa9   :  { %vm190_vm1 = vcmp.eq.s32.totalorder %v186_v17, %v183_v16  ;;  %vm191_vm2 = vcmp.eq.s32.totalorder %v189_v18, %v183_v16  ;;  %v2309_v17 = vor.u32 %v2826_v12, %v2306_v14 }
  0xaa   :  { %v2246_v20 = vsel %vm190_vm1, 1.0, %v3280_v19  ;;  %v2247_v21 = vsel %vm191_vm2, 1.0, %v3280_v19 }
  0xab   :  { %2252 = vmatmul.msk.f32.vlgmr.msra.gmra.mxu2 %vm250_vm0, %v2246_v20  ;;  %527 = vmatpush.bf16.msrb.mxu3 %v2309_v17  ;;  %v2824_v20 = vld [vmem:[#allocation7 + $0x50] sm:$0xf0] }
  0xb0   :  { %v200_v22 = vpop.permute.xlu0 %199  ;;  %v203_v24 = vpop.permute.xlu1 %202 }
  0xb1   :  { %vm204_vm4 = vcmp.eq.s32.totalorder %v200_v22, %v183_v16  ;;  %vm205_vm5 = vcmp.eq.s32.totalorder %v203_v24, %v183_v16  ;;  %v2828_v16 = vld [vmem:[#allocation7 + $0x70] sm:$0xf0]  ;;  %v2300_v24 = vld [vmem:[#allocation7 + $0x50] sm:$0xf] }
  0xb2   :  { %v2248_v23 = vsel %vm204_vm4, 1.0, %v3280_v19  ;;  %v2249_v25 = vsel %vm205_vm5, 1.0, %v3280_v19  ;;  %v2313_v18 = vor.u32 %v2828_v16, %v2312_v15  ;;  %v2292_v19 = vld [vmem:[#allocation7 + $0x48] sm:$0xf] }
  0xb3   :  { %2250 = vmatmul.msk.f32.vlgmr.msra.gmra.mxu3 %vm220_vm3, %v2248_v23  ;;  %2253 = vmatmul.msk.f32.gmra.mxu2 %vm250_vm0, %v2247_v21  ;;  %v2823_v21 = vld [vmem:[#allocation7 + $0x4c] sm:$0xf]  ;;  %v2293_v22 = vor.u32 %v2824_v20, %v2292_v19  ;;  %v2294_v23 = vld [vmem:[#allocation7 + $0x54] sm:$0xf0] }
  0xb4   :  { %541 = vmatpush.bf16.msra.mxu0 %v2313_v18  ;;  %v2980_v18 = vld [vmem:[%s3681_s7] ss:$0 sm:$0xff] }
  0xb5   :  { %514 = vmatpush.bf16.msrb.mxu2 %v2293_v22 }
  0xbb   :  { %2251 = vmatmul.msk.f32.gmra.mxu3 %vm220_vm3, %v2249_v25  ;;  %v2825_v25 = vld [vmem:[#allocation7 + $0x58] sm:$0xf0] }
 0x12e   :  { %v274_v26 = vpop.f32.mrf.mxu2 }
 0x136   :  { %v244_v27 = vpop.f32.mrf.mxu3  ;;  %v277_v29 = vpop.f32.mrf.mxu2 }
 0x137   :  { %v275_v28 = vadd.f32 %v274_v26, %v244_v27  ;;  %v2297_v26 = vor.u32 %v2823_v21, %v2294_v23  ;;  %v2301_v27 = vor.u32 %v2825_v25, %v2300_v24 }
 0x139   :  { %282 = vadd.xlane.f32.xlu2 %v275_v28  ;;  %528 = vmatpush.bf16.msrb.mxu3 %v2297_v26 }
 0x13a   :  { %542 = vmatpush.bf16.msra.mxu0 %v2301_v27 }
 0x13e   :  { %v247_v30 = vpop.f32.mrf.mxu3  ;;  %543 = vmatpush.bf16.msra.mxu0 %v2289_v36 }
 0x13f   :  { %v278_v31 = vadd.f32 %v277_v29, %v247_v30  ;;  %v2821_v29 = vld [vmem:[#allocation7 + $0x38] sm:$0xf0]  ;;  %v2820_v30 = vld [vmem:[#allocation7 + $0x34] sm:$0xf] }
 0x140   :  { %v2285_v35 = vor.u32 %v2820_v30, %v2282_v32 }
 0x141   :  { %284 = vadd.xlane.f32.xlu2 %v278_v31 }
 0x142   :  { %529 = vmatpush.bf16.msrb.mxu3 %v2285_v35 }
 0x1ac   :  { %v283_v39 = vpop.xlane.xlu2 %282 }
 0x1ad   :  { %v293_v40 = vmul.f32 %v3456_v38, %v283_v39  ;;  %v2818_v39 = vld [vmem:[#allocation7 + $0x20] sm:$0xf0] }
 0x1af   :  { %v3459_v41 = vsub.f32 %v275_v28, %v293_v40  ;;  %v2280_v28 = vld [vmem:[#allocation7 + $0x30] sm:$0xf]  ;;  %v2817_v40 = vld [vmem:[#allocation7 + $0x1c] sm:$0xf] }
 0x1b1   :  { %v297_v42 = vmul.f32 %v3459_v41, %v3459_v41 }
 0x1b3   :  { %299 = vadd.xlane.f32.xlu0 %v297_v42  ;;  %v2269_v42 = vor.u32 %v2818_v39, %v2268_v37 }
 0x1b4   :  { %v285_v43 = vpop.xlane.xlu2 %284 }
 0x1b5   :  { %v294_v44 = vmul.f32 %v3456_v38, %v285_v43  ;;  %v2270_v43 = vld [vmem:[#allocation7 + $0x24] sm:$0xf0] }
 0x1b6   :  { %v2273_v47 = vor.u32 %v2817_v40, %v2270_v43 }
 0x1b7   :  { %v3464_v45 = vsub.f32 %v278_v31, %v294_v44  ;;  %v2281_v31 = vor.u32 %v2821_v29, %v2280_v28  ;;  %v2276_v44 = vld [vmem:[#allocation7 + $0x20] sm:$0xf] }
 0x1b8   :  { %530 = vmatpush.bf16.msrb.mxu3 %v2273_v47 }
 0x1b9   :  { %v298_v46 = vmul.f32 %v3464_v45, %v3464_v45  ;;  %515 = vmatpush.bf16.msrb.mxu2 %v2281_v31 }
 0x1bb   :  { %301 = vadd.xlane.f32.xlu1 %v298_v46  ;;  %v2819_v46 = vld [vmem:[#allocation7 + $0x28] sm:$0xf0] }
 0x1bc   :  { %v2277_v48 = vor.u32 %v2819_v46, %v2276_v44  ;;  %531 = vmatpush.bf16.msrb.mxu3 %v2261_v58 }
 0x1bd   :  { %516 = vmatpush.bf16.msrb.mxu2 %v2269_v42 }
 0x1be   :  { %544 = vmatpush.bf16.msra.mxu0 %v2277_v48 }
 0x1c1   :  { %517 = vmatpush.bf16.msrb.mxu2 %v2257_v53 }
 0x1c2   :  { %545 = vmatpush.bf16.msra.mxu0 %v2265_v59 }
 0x226   :  { %v300_v52 = vpop.xlane.xlu0 %299 }
 0x227   :  { %v303_v57 = vmul.f32 %v300_v52, %v3456_v38 }
 0x229   :  { %v305_v60 = vadd.f32 1e-12, %v303_v57  ;;  %v3493_v57 = vld [vmem:[%s3719_s2] sm:$0xff] }
 0x22b   :  { %2996 = vrsqrt.f32 %v305_v60  ;;  %vm313_vm8 = vweird.f32 %v305_v60 }
 0x22e   :  { %v302_v61 = vpop.xlane.xlu1 %301 }
 0x22f   :  { %v304_v62 = vmul.f32 %v302_v61, %v3456_v38 }
 0x231   :  { %v2997_v63 = vpop.eup %2996  ;;  %v306_v0 = vadd.f32 1e-12, %v304_v62 }
 0x232   :  { %v308_v1 = vmul.f32 %v2997_v63, %v305_v60  ;;  %vm314_vm7 = vweird.f32 %v2997_v63 }
 0x233   :  { %2998 = vrsqrt.f32 %v306_v0  ;;  %vm315_vm9 = vmor %vm313_vm8, %vm314_vm7  ;;  %vm323_vm11 = vweird.f32 %v306_v0 }
 0x234   :  { %v309_v2 = vmul.f32 %v2997_v63, %v308_v1 }
 0x236   :  { %v310_v3 = vmul.f32 0.5, %v309_v2 }
 0x238   :  { %v311_v4 = vsub.f32 1.5, %v310_v3 }
 0x239   :  { %v2999_v5 = vpop.eup %2998 }
 0x23a   :  { %v312_v6 = vmul.f32 %v2997_v63, %v311_v4  ;;  %v318_v7 = vmul.f32 %v2999_v5, %v306_v0  ;;  %vm324_vm10 = vweird.f32 %v2999_v5  ;;  %v3502_v0 = vld [vmem:[%s3719_s2 + $0x8] sm:$0xff] }
 0x23b   :  { %vm325_vm12 = vmor %vm323_vm11, %vm324_vm10 }
 0x23c   :  { %v319_v8 = vmul.f32 %v2999_v5, %v318_v7  ;;  %v316_v9 = vsel %vm315_vm9, %v2997_v63, %v312_v6 }
 0x23d   :  { %v327_v12 = vmul.f32 %v316_v9, %v3459_v41 }
 0x23e   :  { %v320_v10 = vmul.f32 0.5, %v319_v8 }
 0x23f   :  { %v332_v17 = vmul.f32 %v2979_v13, %v327_v12 }
 0x240   :  { %v321_v11 = vsub.f32 1.5, %v320_v10 }
 0x241   :  { %v3475_v20 = vadd.f32 %v2980_v18, %v332_v17 }
 0x242   :  { %v322_v14 = vmul.f32 %v2999_v5, %v321_v11 }
 0x244   :  { %v326_v15 = vsel %vm325_vm12, %v2999_v5, %v322_v14 }
 0x245   :  { %v328_v16 = vmul.f32 %v326_v15, %v3464_v45  ;;  %v374_v45 = vld [vmem:[%s3683_s9] sm:$0x7] }
 0x246   :  { %v376_v25 = vperm.slane %v374_v45, 0  ;;  %v377_v26 = vperm.slane %v374_v45, 1  ;;  %v378_v27 = vperm.slane %v374_v45, 2 }
 0x247   :  { %v333_v19 = vmul.f32 %v2979_v13, %v328_v16 }
 0x249   :  { %v3477_v21 = vadd.f32 %v2980_v18, %v333_v19 }
 0x24b   :  { %v341_v41 = vpack.c.bf16 %v3477_v21, %v3475_v20 }
 0x24d   :  { %518 = vmatmul.bf16.vlgmr.msrb.gmra.mxu2 %v341_v41  ;;  %532 = vmatmul.bf16.vlgmr.msrb.gmra.mxu3 %v341_v41 }
 0x24e   :  { %546 = vmatmul.bf16.vlgmr.msra.gmra.mxu0 %v341_v41 }
 0x2cb   :  { %v547_v22 = vpop.f32.mrf.mxu0 }
 0x2cc   :  { %v548_v32 = vadd.f32 %v547_v22, %v378_v27 }
 0x2ce   :  { %v553_v40 = vpack.c.bf16 %v548_v32, %v548_v32 }
 0x2d0   :  { %v519_v23 = vpop.f32.mrf.mxu2  ;;  %v533_v24 = vpop.f32.mrf.mxu3  ;;  %v609_v47 = vunpack.c.l.b16 %v553_v40 }
 0x2d1   :  { %v520_v29 = vadd.f32 %v519_v23, %v376_v25  ;;  %v534_v30 = vadd.f32 %v533_v24, %v377_v26 }
 0x2d3   :  { %v549_v28 = vpop.f32.mrf.mxu0  ;;  %v552_v35 = vpack.c.bf16 %v534_v30, %v520_v29 }
 0x2d4   :  { %v550_v31 = vadd.f32 %v549_v28, %v378_v27 }
 0x2d5   :  { %v561_v44 = vunpack.c.h.b16 %v552_v35  ;;  %v558_v52 = vunpack.c.l.b16 %v552_v35 }
 0x2d6   :  { %v555_v36 = vpack.c.bf16 %v550_v31, %v550_v31 }
 0x2d8   :  { %v521_v33 = vpop.f32.mrf.mxu2  ;;  %v535_v34 = vpop.f32.mrf.mxu3  ;;  %v610_v43 = vunpack.c.l.b16 %v555_v36 }
 0x2d9   :  { %v522_v37 = vadd.f32 %v521_v33, %v376_v25  ;;  %v536_v39 = vadd.f32 %v535_v34, %v377_v26 }
 0x2da   :  { %v611_v50 = vpack.c.b16 %v610_v43, %v609_v47  ;;  %v2843_v47 = vld [vmem:[#allocation8 + $0x28] sm:$0xff] }
 0x2db   :  { %v554_v42 = vpack.c.bf16 %v536_v39, %v522_v37 }
 0x2dd   :  { %v562_v46 = vunpack.c.h.b16 %v554_v42  ;;  %v559_v51 = vunpack.c.l.b16 %v554_v42 }
 0x2df   :  { %v563_v48 = vpack.c.b16 %v562_v46, %v561_v44  ;;  %v560_v53 = vpack.c.b16 %v559_v51, %v558_v52  ;;  %v2845_v44 = vld [vmem:[#allocation8 + $0x38] sm:$0xff]  ;;  %v2844_v46 = vld [vmem:[#allocation8 + $0x30] sm:$0xff]  ;;  %v2839_v52 = vld [vmem:[#allocation8 + $0x8] sm:$0xff] }
 0x2e0   :  { %776 = vmatpush.bf16.msrb.mxu0 %v2845_v44 }
 0x2e1   :  { %632 = vrot.lane.b32.xlu2 %v563_v48, %s3715_s6  ;;  %v568_v49 = vsel %vm250_vm0, %v563_v48, 0  ;;  %v2842_v48 = vld [vmem:[#allocation8 + $0x20] sm:$0xff] }
 0x2e2   :  { %577 = vmatpush.bf16.xpose.msra.mxu1 %v568_v49  ;;  %v2841_v49 = vld [vmem:[#allocation8 + $0x18] sm:$0xff] }
 0x2e4   :  { %777 = vmatpush.bf16.msrb.mxu0 %v2844_v46  ;;  %v2414_v46 = vld [vmem:[#allocation10 + $0x38] sm:$0xf0] }
 0x2e8   :  { %778 = vmatpush.bf16.msrb.mxu0 %v2843_v47 }
 0x2e9   :  { %630 = vrot.lane.b32.xlu2 %v560_v53, %s3715_s6  ;;  %2350 = vmatmul.msk.bf16.vlgmr.msra.gmra.mxu1 %vm250_vm0, %v560_v53 }
 0x2ea   :  { %623 = vmatpush.bf16.msrb.mxu1 %v611_v50 }
 0x2ec   :  { %779 = vmatpush.bf16.msrb.mxu0 %v2842_v48  ;;  %v2404_v48 = vld [vmem:[#allocation10 + $0x20] sm:$0xf] }
 0x2f0   :  { %780 = vmatpush.bf16.msrb.mxu0 %v2841_v49  ;;  %v2851_v49 = vld [vmem:[#allocation10 + $0x24] sm:$0xf0] }
 0x33b   :  { %v633_v54 = vpop.permute.xlu2 %632 }
 0x33c   :  { %v638_v55 = vsel %vm250_vm0, %v633_v54, 0 }
 0x33d   :  { %647 = vmatpush.bf16.xpose.msra.mxu2 %v638_v55  ;;  %v2838_v55 = vld [vmem:[#allocation8] sm:$0xff] }
 0x343   :  { %v631_v56 = vpop.permute.xlu2 %630 }
 0x344   :  { %2352 = vmatmul.msk.bf16.vlgmr.msra.gmra.mxu2 %vm250_vm0, %v631_v56 }
 0x366   :  { %v579_v58 = vpop.f32.mrf.mxu1 }
 0x367   :  { %v580_v59 = vadd.f32 %v579_v58, %v3493_v57 }
 0x369   :  { %v584_v60 = vsel %vm220_vm3, %v580_v59, -inf }
 0x36a   :  { %585 = vmax.xlane.f32.xlu1 %v584_v60 }
 0x36e   :  { %v581_v4 = vpop.f32.mrf.mxu1 }
 0x36f   :  { %v582_v5 = vadd.f32 %v581_v4, %v3502_v0 }
 0x371   :  { %v587_v6 = vsel %vm220_vm3, %v582_v5, -inf }
 0x3c7   :  { %v649_v61 = vpop.f32.mrf.mxu2 }
 0x3c8   :  { %v650_v62 = vadd.f32 %v649_v61, %v3493_v57 }
 0x3ca   :  { %v654_v63 = vsel %vm220_vm3, %v650_v62, -inf }
 0x3cb   :  { %655 = vmax.xlane.f32.xlu2 %v654_v63 }
 0x3cf   :  { %v651_v1 = vpop.f32.mrf.mxu2 }
 0x3d0   :  { %v652_v2 = vadd.f32 %v651_v1, %v3502_v0 }
 0x3d2   :  { %v657_v3 = vsel %vm220_vm3, %v652_v2, -inf }
 0x3d3   :  { %658 = vmax.xlane.f32.xlu0 %v657_v3 }
 0x3db   :  { %588 = vmax.xlane.f32.xlu0 %v587_v6 }
 0x3dd   :  { %v586_v10 = vpop.xlane.xlu1 %585 }
 0x3de   :  { %v590_v14 = vsub.f32 %v580_v59, %v586_v10 }
 0x3e0   :  { %v592_v17 = vmul.f32 1.442695, %v590_v14 }
 0x43e   :  { %v656_v7 = vpop.xlane.xlu2 %655 }
 0x43f   :  { %v660_v8 = vsub.f32 %v650_v62, %v656_v7 }
 0x441   :  { %v662_v9 = vmul.f32 1.442695, %v660_v8 }
 0x443   :  { %3000 = vpow2.f32 %v662_v9 }
 0x446   :  { %v659_v11 = vpop.xlane.xlu0 %658 }
 0x447   :  { %v661_v12 = vsub.f32 %v652_v2, %v659_v11  ;;  %v2981_v2 = vld [vmem:[%s3685_s11] ss:$0 sm:$0xff] }
 0x449   :  { %v3001_v13 = vpop.eup %3000  ;;  %v664_v15 = vmul.f32 1.442695, %v661_v12 }
 0x44a   :  { %v666_v16 = vsel %vm220_vm3, %v3001_v13, 0.0 }
 0x44b   :  { %3002 = vpow2.f32 %v664_v15  ;;  %667 = vadd.xlane.f32.xlu1 %v666_v16  ;;  %v2861_v16 = vld [vmem:[#allocation10 + $0x74] sm:$0xf0] }
 0x44c   :  { %3004 = vpow2.f32 %v592_v17  ;;  %v2860_v17 = vld [vmem:[#allocation10 + $0x74] sm:$0xf] }
 0x44e   :  { %v589_v18 = vpop.xlane.xlu0 %588 }
 0x44f   :  { %v591_v19 = vsub.f32 %v582_v5, %v589_v18 }
 0x451   :  { %v3003_v41 = vpop.eup %3002  ;;  %v594_v22 = vmul.f32 1.442695, %v591_v19  ;;  %v2446_v19 = vld [vmem:[#allocation10 + $0x78] sm:$0xf0] }
 0x452   :  { %v669_v45 = vsel %vm220_vm3, %v3003_v41, 0.0  ;;  %v3005_v23 = vpop.eup %3004 }
 0x453   :  { %3006 = vpow2.f32 %v594_v22  ;;  %670 = vadd.xlane.f32.xlu0 %v669_v45  ;;  %v596_v26 = vsel %vm220_vm3, %v3005_v23, 0.0  ;;  %v2436_v22 = vld [vmem:[#allocation10 + $0x60] sm:$0xf]  ;;  %v2859_v45 = vld [vmem:[#allocation10 + $0x64] sm:$0xf0] }
 0x459   :  { %v3007_v24 = vpop.eup %3006 }
 0x45a   :  { %v599_v25 = vsel %vm220_vm3, %v3007_v24, 0.0 }
 0x45b   :  { %600 = vadd.xlane.f32.xlu2 %v599_v25  ;;  %597 = vadd.xlane.f32.xlu0 %v596_v26  ;;  %v2438_v25 = vld [vmem:[#allocation10 + $0x68] sm:$0xf0] }
 0x464   :  { %677 = vrot.lane.b32.xlu1 %v611_v50, %s3715_s6  ;;  %v2840_v50 = vld [vmem:[#allocation8 + $0x10] sm:$0xff] }
 0x465   :  { %781 = vmatpush.bf16.msrb.mxu0 %v2840_v50  ;;  %v2850_v50 = vld [vmem:[#allocation10 + $0x24] sm:$0xf] }
 0x469   :  { %782 = vmatpush.bf16.msrb.mxu0 %v2839_v52  ;;  %v2406_v52 = vld [vmem:[#allocation10 + $0x28] sm:$0xf0] }
 0x46d   :  { %783 = vmatpush.bf16.msrb.mxu0 %v2838_v55  ;;  %v2849_v55 = vld [vmem:[#allocation10 + $0x14] sm:$0xf0] }
 0x4be   :  { %v668_v28 = vpop.xlane.xlu1 %667 }
 0x4c6   :  { %v671_v27 = vpop.xlane.xlu0 %670 }
 0x4c7   :  { %3008 = vrcp.f32 %v671_v27  ;;  %v2428_v27 = vld [vmem:[#allocation10 + $0x50] sm:$0xf] }
 0x4c8   :  { %3010 = vrcp.f32 %v668_v28  ;;  %v2857_v28 = vld [vmem:[#allocation10 + $0x54] sm:$0xf0] }
 0x4cd   :  { %v3009_v31 = vpop.eup %3008 }
 0x4ce   :  { %v601_v29 = vpop.xlane.xlu2 %600  ;;  %v598_v30 = vpop.xlane.xlu0 %597  ;;  %v675_v33 = vmul.f32 %v3009_v31, %v3003_v41  ;;  %v2449_v41 = vor.u32 %v2860_v17, %v2446_v19  ;;  %v2430_v31 = vld [vmem:[#allocation10 + $0x58] sm:$0xf0] }
 0x4cf   :  { %3012 = vrcp.f32 %v601_v29  ;;  %v3011_v32 = vpop.eup %3010  ;;  %v2856_v29 = vld [vmem:[#allocation10 + $0x54] sm:$0xf] }
 0x4d0   :  { %3014 = vrcp.f32 %v598_v30  ;;  %v674_v36 = vmul.f32 %v3011_v32, %v3001_v13  ;;  %961 = vmatpush.bf16.msrb.mxu2 %v2449_v41  ;;  %v2429_v30 = vor.u32 %v2857_v28, %v2428_v27  ;;  %v2433_v32 = vor.u32 %v2856_v29, %v2430_v31  ;;  %v2983_v28 = vld [vmem:[%s3687_s13] ss:$0 sm:$0xff] }
 0x4d2   :  { %v676_v42 = vpack.c.bf16 %v675_v33, %v674_v36  ;;  %v2420_v33 = vld [vmem:[#allocation10 + $0x40] sm:$0xf] }
 0x4d5   :  { %v3013_v34 = vpop.eup %3012 }
 0x4d6   :  { %v3015_v35 = vpop.eup %3014  ;;  %v605_v37 = vmul.f32 %v3013_v34, %v3007_v24  ;;  %v678_v39 = vpop.permute.xlu1 %677  ;;  %v2437_v24 = vor.u32 %v2859_v45, %v2436_v22  ;;  %v2855_v34 = vld [vmem:[#allocation10 + $0x44] sm:$0xf0] }
 0x4d7   :  { %v604_v40 = vmul.f32 %v3015_v35, %v3005_v23  ;;  %690 = vmatpush.bf16.msra.mxu3 %v678_v39  ;;  %v2858_v23 = vld [vmem:[#allocation10 + $0x64] sm:$0xf]  ;;  %v2421_v36 = vor.u32 %v2855_v34, %v2420_v33  ;;  %v2868_v33 = vld [vmem:[#allocation11 + $0x30] sm:$0xff]  ;;  %v2867_v34 = vld [vmem:[#allocation11 + $0x28] sm:$0xff] }
 0x4d8   :  { %v2441_v26 = vor.u32 %v2858_v23, %v2438_v25  ;;  %v2854_v35 = vld [vmem:[#allocation10 + $0x44] sm:$0xf]  ;;  %v2982_v23 = vld [vmem:[%s3686_s12] ss:$0 sm:$0xff] }
 0x4d9   :  { %v606_v43 = vpack.c.bf16 %v605_v37, %v604_v40  ;;  %v2422_v37 = vld [vmem:[#allocation10 + $0x48] sm:$0xf0]  ;;  %v2412_v40 = vld [vmem:[#allocation10 + $0x30] sm:$0xf] }
 0x4da   :  { %2353 = vmatmul.msk.bf16.vlgmr.msra.gmra.mxu3 %vm220_vm3, %v676_v42  ;;  %962 = vmatpush.bf16.msrb.mxu2 %v2441_v26  ;;  %v2425_v39 = vor.u32 %v2854_v35, %v2422_v37  ;;  %v2853_v42 = vld [vmem:[#allocation10 + $0x34] sm:$0xf0]  ;;  %v2876_v35 = vld [vmem:[#allocation11 + $0x70] sm:$0xff]  ;;  %v2875_v37 = vld [vmem:[#allocation11 + $0x68] sm:$0xff] }
 0x4db   :  { %2351 = vmatmul.msk.bf16.vlgmr.msrb.gmra.mxu1 %vm220_vm3, %v606_v43  ;;  %v2852_v43 = vld [vmem:[#allocation10 + $0x34] sm:$0xf]  ;;  %v2413_v44 = vor.u32 %v2853_v42, %v2412_v40  ;;  %v2874_v40 = vld [vmem:[#allocation11 + $0x60] sm:$0xff] }
 0x4dc   :  { %v2417_v47 = vor.u32 %v2852_v43, %v2414_v46  ;;  %v2864_v42 = vld [vmem:[#allocation11 + $0x10] sm:$0xff]  ;;  %v861_v43 = vld [vmem:[%s3689_s15] sm:$0x3]  ;;  %v2863_v46 = vld [vmem:[#allocation11 + $0x8] sm:$0xff] }
 0x4de   :  { %963 = vmatpush.bf16.msrb.mxu2 %v2433_v32  ;;  %v2869_v32 = vld [vmem:[#allocation11 + $0x38] sm:$0xff] }
 0x4df   :  { %1145 = vmatpush.bf16.msrb.mxu3 %v2869_v32 }
 0x4e2   :  { %964 = vmatpush.bf16.msrb.mxu2 %v2425_v39  ;;  %v2865_v39 = vld [vmem:[#allocation11 + $0x18] sm:$0xff] }
 0x4e3   :  { %1146 = vmatpush.bf16.msrb.mxu3 %v2868_v33 }
 0x4e6   :  { %965 = vmatpush.bf16.msrb.mxu2 %v2417_v47  ;;  %v863_v47 = vperm.slane %v861_v43, 0 }
 0x4e7   :  { %1147 = vmatpush.bf16.msrb.mxu3 %v2867_v34 }
 0x558   :  { %v625_v56 = vpop.f32.mrf.mxu1 }
 0x55d   :  { %v692_v51 = vpop.f32.mrf.mxu3 }
 0x560   :  { %v627_v61 = vpop.f32.mrf.mxu1 }
 0x565   :  { %v694_v53 = vpop.f32.mrf.mxu3 }
 0x566   :  { %v2969_v54 = vpack.i.bf16 %v694_v53, %v692_v51  ;;  %v2405_v51 = vor.u32 %v2851_v49, %v2404_v48  ;;  %v2409_v53 = vor.u32 %v2850_v50, %v2406_v52  ;;  %v2872_v48 = vld [vmem:[#allocation11 + $0x50] sm:$0xff]  ;;  %v2862_v50 = vld [vmem:[#allocation11] sm:$0xff]  ;;  %v2871_v52 = vld [vmem:[#allocation11 + $0x48] sm:$0xff] }
 0x568   :  { %2970 = vrot.lane.b32.xlu0 %v2969_v54, %s3715_s6  ;;  %966 = vmatpush.bf16.msrb.mxu2 %v2409_v53  ;;  %v2396_v54 = vld [vmem:[#allocation10 + $0x10] sm:$0xf] }
 0x5da   :  { %v2971_v58 = vpop.permute.xlu0 %2970 }
 0x5db   :  { %v2973_v59 = vunpack.i.h.bf16 %v2971_v58  ;;  %v2972_v60 = vunpack.i.l.bf16 %v2971_v58  ;;  %v2397_v58 = vor.u32 %v2849_v55, %v2396_v54  ;;  %v864_v54 = vperm.slane %v861_v43, 1 }
 0x5dd   :  { %v705_v62 = vsel %vm250_vm0, %v625_v56, %v2972_v60  ;;  %v706_v63 = vsel %vm250_vm0, %v627_v61, %v2973_v59  ;;  %v2848_v56 = vld [vmem:[#allocation10 + $0x14] sm:$0xf]  ;;  %v2398_v59 = vld [vmem:[#allocation10 + $0x18] sm:$0xf0]  ;;  %v2388_v60 = vld [vmem:[#allocation10] sm:$0xf] }
 0x5de   :  { %v707_v1 = vpack.c.bf16 %v706_v63, %v705_v62  ;;  %v2847_v61 = vld [vmem:[#allocation10 + $0x4] sm:$0xf0]  ;;  %v2401_v63 = vor.u32 %v2848_v56, %v2398_v59 }
 0x5e0   :  { %784 = vmatmul.bf16.vlgmr.msrb.gmra.mxu0 %v707_v1  ;;  %v2846_v1 = vld [vmem:[#allocation10 + $0x4] sm:$0xf]  ;;  %967 = vmatpush.bf16.msrb.mxu2 %v2401_v63 }
 0x65d   :  { %v785_v3 = vpop.f32.mrf.mxu0 }
 0x65e   :  { %v786_v4 = vadd.f32 %v2981_v2, %v785_v3 }
 0x660   :  { %v790_v5 = vadd.f32 %v786_v4, %v3475_v20  ;;  %v2389_v4 = vor.u32 %v2847_v61, %v2388_v60 }
 0x662   :  { %794 = vadd.xlane.f32.xlu2 %v790_v5 }
 0x665   :  { %v787_v6 = vpop.f32.mrf.mxu0 }
 0x666   :  { %v788_v7 = vadd.f32 %v2981_v2, %v787_v6  ;;  %v2390_v2 = vld [vmem:[#allocation10 + $0x8] sm:$0xf0] }
 0x668   :  { %v791_v8 = vadd.f32 %v788_v7, %v3477_v21  ;;  %v2444_v21 = vld [vmem:[#allocation10 + $0x70] sm:$0xf] }
 0x669   :  { %v2445_v18 = vor.u32 %v2861_v16, %v2444_v21 }
 0x66a   :  { %796 = vadd.xlane.f32.xlu1 %v791_v8 }
 0x66b   :  { %947 = vmatpush.bf16.msra.mxu1 %v2445_v18 }
 0x66f   :  { %948 = vmatpush.bf16.msra.mxu1 %v2437_v24 }
 0x673   :  { %949 = vmatpush.bf16.msra.mxu1 %v2429_v30 }
 0x677   :  { %950 = vmatpush.bf16.msra.mxu1 %v2421_v36  ;;  %v2866_v36 = vld [vmem:[#allocation11 + $0x20] sm:$0xff] }
 0x678   :  { %1148 = vmatpush.bf16.msrb.mxu3 %v2866_v36 }
 0x67b   :  { %951 = vmatpush.bf16.msra.mxu1 %v2413_v44  ;;  %v2873_v44 = vld [vmem:[#allocation11 + $0x58] sm:$0xff] }
 0x67c   :  { %1149 = vmatpush.bf16.msrb.mxu3 %v2865_v39 }
 0x67f   :  { %952 = vmatpush.bf16.msra.mxu1 %v2405_v51 }
 0x680   :  { %1150 = vmatpush.bf16.msrb.mxu3 %v2864_v42 }
 0x683   :  { %953 = vmatpush.bf16.msra.mxu1 %v2397_v58  ;;  %v2870_v58 = vld [vmem:[#allocation11 + $0x40] sm:$0xff] }
 0x684   :  { %1151 = vmatpush.bf16.msrb.mxu3 %v2863_v46 }
 0x687   :  { %954 = vmatpush.bf16.msra.mxu1 %v2389_v4 }
 0x688   :  { %1152 = vmatpush.bf16.msrb.mxu3 %v2862_v50 }
 0x6d5   :  { %v795_v9 = vpop.xlane.xlu2 %794 }
 0x6d6   :  { %v798_v10 = vmul.f32 %v795_v9, %v3456_v38 }
 0x6d8   :  { %v3524_v11 = vsub.f32 %v790_v5, %v798_v10  ;;  %v2393_v5 = vor.u32 %v2846_v1, %v2390_v2 }
 0x6da   :  { %v802_v12 = vmul.f32 %v3524_v11, %v3524_v11  ;;  %968 = vmatpush.bf16.msrb.mxu2 %v2393_v5 }
 0x6dc   :  { %804 = vadd.xlane.f32.xlu2 %v802_v12 }
 0x6dd   :  { %v797_v13 = vpop.xlane.xlu1 %796 }
 0x6de   :  { %v799_v14 = vmul.f32 %v797_v13, %v3456_v38 }
 0x6e0   :  { %v3529_v15 = vsub.f32 %v791_v8, %v799_v14 }
 0x6e2   :  { %v803_v20 = vmul.f32 %v3529_v15, %v3529_v15 }
 0x6e4   :  { %806 = vadd.xlane.f32.xlu0 %v803_v20 }
 0x74f   :  { %v805_v62 = vpop.xlane.xlu2 %804 }
 0x750   :  { %v808_v3 = vmul.f32 %v805_v62, %v3456_v38 }
 0x752   :  { %v810_v6 = vadd.f32 1e-12, %v808_v3 }
 0x754   :  { %3016 = vrsqrt.f32 %v810_v6  ;;  %vm818_vm14 = vweird.f32 %v810_v6 }
 0x757   :  { %v807_v7 = vpop.xlane.xlu0 %806 }
 0x758   :  { %v809_v8 = vmul.f32 %v807_v7, %v3456_v38 }
 0x75a   :  { %v3017_v9 = vpop.eup %3016  ;;  %v811_v10 = vadd.f32 1e-12, %v809_v8 }
 0x75b   :  { %v813_v12 = vmul.f32 %v3017_v9, %v810_v6  ;;  %vm819_vm13 = vweird.f32 %v3017_v9 }
 0x75c   :  { %3018 = vrsqrt.f32 %v811_v10  ;;  %vm820_vm15 = vmor %vm818_vm14, %vm819_vm13  ;;  %vm828_vm2 = vweird.f32 %v811_v10 }
 0x75d   :  { %v814_v13 = vmul.f32 %v3017_v9, %v813_v12 }
 0x75f   :  { %v815_v14 = vmul.f32 0.5, %v814_v13 }
 0x761   :  { %v816_v20 = vsub.f32 1.5, %v815_v14 }
 0x762   :  { %v3019_v21 = vpop.eup %3018 }
 0x763   :  { %v817_v16 = vmul.f32 %v3017_v9, %v816_v20  ;;  %v823_v17 = vmul.f32 %v3019_v21, %v811_v10  ;;  %vm829_vm1 = vweird.f32 %v3019_v21 }
 0x764   :  { %vm830_vm4 = vmor %vm828_vm2, %vm829_vm1 }
 0x765   :  { %v824_v18 = vmul.f32 %v3019_v21, %v823_v17  ;;  %v821_v19 = vsel %vm820_vm15, %v3017_v9, %v817_v16 }
 0x766   :  { %v832_v45 = vmul.f32 %v821_v19, %v3524_v11 }
 0x767   :  { %v825_v41 = vmul.f32 0.5, %v824_v18 }
 0x768   :  { %v837_v27 = vmul.f32 %v2982_v23, %v832_v45 }
 0x769   :  { %v826_v22 = vsub.f32 1.5, %v825_v41 }
 0x76a   :  { %v3543_v30 = vadd.f32 %v2983_v28, %v837_v27 }
 0x76b   :  { %v827_v24 = vmul.f32 %v3019_v21, %v826_v22 }
 0x76d   :  { %v831_v25 = vsel %vm830_vm4, %v3019_v21, %v827_v24 }
 0x76e   :  { %v833_v26 = vmul.f32 %v831_v25, %v3529_v15  ;;  %v2877_v15 = vld [vmem:[#allocation11 + $0x78] sm:$0xff] }
 0x76f   :  { %1159 = vmatpush.bf16.msra.mxu0 %v2877_v15 }
 0x770   :  { %v838_v29 = vmul.f32 %v2982_v23, %v833_v26 }
 0x772   :  { %v3545_v31 = vadd.f32 %v2983_v28, %v838_v29 }
 0x773   :  { %1160 = vmatpush.bf16.msra.mxu0 %v2876_v35 }
 0x774   :  { %v844_v11 = vpack.c.bf16 %v3545_v31, %v3543_v30 }
 0x776   :  { %955 = vmatmul.bf16.vlgmr.msra.gmra.mxu1 %v844_v11  ;;  %969 = vmatmul.bf16.vlgmr.msrb.gmra.mxu2 %v844_v11 }
 0x777   :  { %1161 = vmatpush.bf16.msra.mxu0 %v2875_v37  ;;  %v2984_v37 = vld [vmem:[%s3691_s17] ss:$0 sm:$0xff] }
 0x77b   :  { %1162 = vmatpush.bf16.msra.mxu0 %v2874_v40 }
 0x77f   :  { %1163 = vmatpush.bf16.msra.mxu0 %v2873_v44 }
 0x783   :  { %1164 = vmatpush.bf16.msra.mxu0 %v2872_v48 }
 0x787   :  { %1165 = vmatpush.bf16.msra.mxu0 %v2871_v52 }
 0x78b   :  { %1166 = vmatpush.bf16.msra.mxu0 %v2870_v58 }
 0x7f3   :  { %v956_v49 = vpop.f32.mrf.mxu1 }
 0x7f4   :  { %v957_v51 = vadd.f32 %v956_v49, %v863_v47 }
 0x7f6   :  { %v975_v53 = vmul.f32 %v957_v51, %v957_v51 }
 0x7f8   :  { %v979_v55 = vmul.f32 %v975_v53, %v957_v51 }
 0x7f9   :  { %v970_v56 = vpop.f32.mrf.mxu2 }
 0x7fa   :  { %v983_v59 = vmul.f32 0.044715, %v979_v55  ;;  %v971_v60 = vadd.f32 %v970_v56, %v864_v54 }
 0x7fb   :  { %v958_v61 = vpop.f32.mrf.mxu1 }
 0x7fc   :  { %v987_v62 = vadd.f32 %v983_v59, %v957_v51  ;;  %v976_v63 = vmul.f32 %v971_v60, %v971_v60  ;;  %v959_v1 = vadd.f32 %v958_v61, %v863_v47  ;;  %v2900_v59 = vld [vmem:[#allocation7 + $0x170] sm:$0xf0] }
 0x7fe   :  { %v991_v2 = vmul.f32 0.7978846, %v987_v62  ;;  %v980_v3 = vmul.f32 %v976_v63, %v971_v60  ;;  %v977_v4 = vmul.f32 %v959_v1, %v959_v1  ;;  %v2603_v62 = vld [vmem:[#allocation7 + $0x174] sm:$0xf0]  ;;  %v2609_v63 = vld [vmem:[#allocation7 + $0x170] sm:$0xf] }
 0x800   :  { %v984_v5 = vmul.f32 0.044715, %v980_v3  ;;  %v981_v6 = vmul.f32 %v977_v4, %v959_v1  ;;  %3020 = vtanh.f32 %v991_v2  ;;  %v2589_v4 = vld [vmem:[#allocation7 + $0x150] sm:$0xf] }
 0x801   :  { %v972_v7 = vpop.f32.mrf.mxu2 }
 0x802   :  { %v988_v8 = vadd.f32 %v984_v5, %v971_v60  ;;  %v985_v9 = vmul.f32 0.044715, %v981_v6  ;;  %v973_v10 = vadd.f32 %v972_v7, %v864_v54  ;;  %v2897_v5 = vld [vmem:[#allocation7 + $0x158] sm:$0xf0]  ;;  %v2896_v6 = vld [vmem:[#allocation7 + $0x154] sm:$0xf] }
 0x803   :  { %v2590_v7 = vor.u32 %v2897_v5, %v2589_v4  ;;  %v2519_v5 = vld [vmem:[#allocation7 + $0xcc] sm:$0xf0] }
 0x804   :  { %v992_v12 = vmul.f32 0.7978846, %v988_v8  ;;  %v989_v13 = vadd.f32 %v985_v9, %v959_v1  ;;  %v978_v14 = vmul.f32 %v973_v10, %v973_v10  ;;  %v2591_v8 = vld [vmem:[#allocation7 + $0x15c] sm:$0xf0]  ;;  %v2597_v9 = vld [vmem:[#allocation7 + $0x158] sm:$0xf] }
 0x806   :  { %v993_v20 = vmul.f32 0.7978846, %v989_v13  ;;  %v982_v21 = vmul.f32 %v978_v14, %v973_v10  ;;  %3022 = vtanh.f32 %v992_v12  ;;  %v3021_v16 = vpop.eup %3020  ;;  %v2594_v12 = vor.u32 %v2896_v6, %v2591_v8  ;;  %v2577_v14 = vld [vmem:[#allocation7 + $0x138] sm:$0xf]  ;;  %v2525_v6 = vld [vmem:[#allocation7 + $0xc8] sm:$0xf] }
 0x807   :  { %v999_v19 = vadd.f32 1.0, %v3021_v16 }
 0x808   :  { %3024 = vtanh.f32 %v993_v20  ;;  %v986_v17 = vmul.f32 0.044715, %v982_v21  ;;  %v2894_v20 = vld [vmem:[#allocation7 + $0x140] sm:$0xf0]  ;;  %v2893_v21 = vld [vmem:[#allocation7 + $0x13c] sm:$0xf] }
 0x809   :  { %v1003_v23 = vmul.f32 0.5, %v999_v19  ;;  %v2578_v16 = vor.u32 %v2894_v20, %v2577_v14  ;;  %v2895_v19 = vld [vmem:[#allocation7 + $0x148] sm:$0xf0] }
 0x80a   :  { %v990_v18 = vadd.f32 %v986_v17, %v973_v10  ;;  %v2579_v17 = vld [vmem:[#allocation7 + $0x144] sm:$0xf0] }
 0x80b   :  { %v1007_v27 = vmul.f32 %v1003_v23, %v957_v51  ;;  %v2891_v23 = vld [vmem:[#allocation7 + $0x128] sm:$0xf0] }
 0x80c   :  { %v994_v41 = vmul.f32 0.7978846, %v990_v18  ;;  %v3023_v22 = vpop.eup %3022  ;;  %v2585_v18 = vld [vmem:[#allocation7 + $0x140] sm:$0xf] }
 0x80d   :  { %v1000_v25 = vadd.f32 1.0, %v3023_v22  ;;  %v2586_v22 = vor.u32 %v2895_v19, %v2585_v18 }
 0x80e   :  { %v3025_v45 = vpop.eup %3024  ;;  %3026 = vtanh.f32 %v994_v41  ;;  %v2582_v41 = vor.u32 %v2893_v21, %v2579_v17 }
 0x80f   :  { %v1001_v24 = vadd.f32 1.0, %v3025_v45  ;;  %v1004_v11 = vmul.f32 0.5, %v1000_v25  ;;  %v2565_v45 = vld [vmem:[#allocation7 + $0x120] sm:$0xf] }
 0x810   :  { %v2566_v25 = vor.u32 %v2891_v23, %v2565_v45 }
 0x811   :  { %v1005_v26 = vmul.f32 0.5, %v1001_v24  ;;  %v1008_v34 = vmul.f32 %v1004_v11, %v971_v60  ;;  %v2899_v60 = vld [vmem:[#allocation7 + $0x16c] sm:$0xf]  ;;  %v2890_v24 = vld [vmem:[#allocation7 + $0x124] sm:$0xf] }
 0x812   :  { %v2606_v2 = vor.u32 %v2899_v60, %v2603_v62 }
 0x813   :  { %v1009_v28 = vmul.f32 %v1005_v26, %v959_v1  ;;  %v2901_v1 = vld [vmem:[#allocation7 + $0x178] sm:$0xf0]  ;;  %v2567_v26 = vld [vmem:[#allocation7 + $0x12c] sm:$0xf0] }
 0x814   :  { %v3027_v29 = vpop.eup %3026  ;;  %v2610_v3 = vor.u32 %v2901_v1, %v2609_v63  ;;  %1412 = vmatpush.bf16.msra.mxu2 %v2606_v2  ;;  %v2517_v63 = vld [vmem:[#allocation7 + $0xc0] sm:$0xf]  ;;  %v2879_v1 = vld [vmem:[#allocation7 + $0xc8] sm:$0xf0]  ;;  %v2878_v2 = vld [vmem:[#allocation7 + $0xc4] sm:$0xf] }
 0x815   :  { %v1002_v32 = vadd.f32 1.0, %v3027_v29  ;;  %v1011_v33 = vpack.c.bf16 %v1009_v28, %v1007_v27  ;;  %v2573_v27 = vld [vmem:[#allocation7 + $0x128] sm:$0xf]  ;;  %v2892_v28 = vld [vmem:[#allocation7 + $0x130] sm:$0xf0]  ;;  %v2570_v29 = vor.u32 %v2890_v24, %v2567_v26  ;;  %v2518_v4 = vor.u32 %v2879_v1, %v2517_v63 }
 0x816   :  { %1426 = vmatpush.bf16.msra.mxu3 %v2610_v3  ;;  %v2574_v11 = vor.u32 %v2892_v28, %v2573_v27  ;;  %v2522_v8 = vor.u32 %v2878_v2, %v2519_v5  ;;  %v2985_v27 = vld [vmem:[%s3692_s18] ss:$0 sm:$0xff] }
 0x817   :  { %v1006_v15 = vmul.f32 0.5, %v1002_v32  ;;  %1153 = vmatmul.bf16.vlgmr.msrb.gmra.mxu3 %v1011_v33  ;;  %v2553_v32 = vld [vmem:[#allocation7 + $0x108] sm:$0xf]  ;;  %v2888_v33 = vld [vmem:[#allocation7 + $0x110] sm:$0xf0] }
 0x818   :  { %1413 = vmatpush.bf16.msra.mxu2 %v2594_v12 }
 0x819   :  { %v1010_v35 = vmul.f32 %v1006_v15, %v973_v10  ;;  %v2898_v10 = vld [vmem:[#allocation7 + $0x160] sm:$0xf0]  ;;  %v2887_v15 = vld [vmem:[#allocation7 + $0x10c] sm:$0xf] }
 0x81a   :  { %v2598_v13 = vor.u32 %v2898_v10, %v2597_v9 }
 0x81b   :  { %v1012_v36 = vpack.c.bf16 %v1010_v35, %v1008_v34  ;;  %v2554_v34 = vor.u32 %v2888_v33, %v2553_v32  ;;  %v2555_v35 = vld [vmem:[#allocation7 + $0x114] sm:$0xf0]  ;;  %v2986_v33 = vld [vmem:[%s3693_s19] ss:$0 sm:$0xff] }
 0x81c   :  { %1427 = vmatpush.bf16.msra.mxu3 %v2598_v13  ;;  %1414 = vmatpush.bf16.msra.mxu2 %v2582_v41 }
 0x81d   :  { %1167 = vmatmul.bf16.vlgmr.msra.gmra.mxu0 %v1012_v36  ;;  %v2561_v36 = vld [vmem:[#allocation7 + $0x110] sm:$0xf] }
 0x820   :  { %1428 = vmatpush.bf16.msra.mxu3 %v2586_v22  ;;  %1415 = vmatpush.bf16.msra.mxu2 %v2570_v29 }
 0x824   :  { %1429 = vmatpush.bf16.msra.mxu3 %v2574_v11 }
 0x89a   :  { %v1154_v39 = vpop.f32.mrf.mxu3  ;;  %v1168_v40 = vpop.f32.mrf.mxu0 }
 0x89b   :  { %v1155_v42 = vadd.f32 %v2984_v37, %v1154_v39  ;;  %v2558_v39 = vor.u32 %v2887_v15, %v2555_v35 }
 0x89d   :  { %v1169_v43 = vadd.f32 %v1168_v40, %v1155_v42  ;;  %1416 = vmatpush.bf16.msra.mxu2 %v2558_v39  ;;  %v2541_v42 = vld [vmem:[#allocation7 + $0xf0] sm:$0xf] }
 0x89f   :  { %v1173_v44 = vadd.f32 %v1169_v43, %v3543_v30  ;;  %v2885_v43 = vld [vmem:[#allocation7 + $0xf8] sm:$0xf0] }
 0x8a1   :  { %1177 = vadd.xlane.f32.xlu2 %v1173_v44 }
 0x8a2   :  { %v1156_v46 = vpop.f32.mrf.mxu3  ;;  %v1170_v48 = vpop.f32.mrf.mxu0 }
 0x8a3   :  { %v1157_v47 = vadd.f32 %v2984_v37, %v1156_v46  ;;  %v2889_v37 = vld [vmem:[#allocation7 + $0x118] sm:$0xf0]  ;;  %v2542_v46 = vor.u32 %v2885_v43, %v2541_v42 }
 0x8a4   :  { %v2562_v40 = vor.u32 %v2889_v37, %v2561_v36 }
 0x8a5   :  { %v1171_v49 = vadd.f32 %v1170_v48, %v1157_v47  ;;  %v2543_v47 = vld [vmem:[#allocation7 + $0xfc] sm:$0xf0]  ;;  %v2549_v48 = vld [vmem:[#allocation7 + $0xf8] sm:$0xf] }
 0x8a6   :  { %1430 = vmatpush.bf16.msra.mxu3 %v2562_v40 }
 0x8a7   :  { %v1174_v50 = vadd.f32 %v1171_v49, %v3545_v31  ;;  %v2601_v31 = vld [vmem:[#allocation7 + $0x168] sm:$0xf]  ;;  %v2886_v49 = vld [vmem:[#allocation7 + $0x100] sm:$0xf0] }
 0x8a8   :  { %v2602_v61 = vor.u32 %v2900_v59, %v2601_v31  ;;  %v2537_v31 = vld [vmem:[#allocation7 + $0xe0] sm:$0xf]  ;;  %v2883_v59 = vld [vmem:[#allocation7 + $0xe8] sm:$0xf0] }
 0x8a9   :  { %1179 = vadd.xlane.f32.xlu2 %v1174_v50  ;;  %v2538_v62 = vor.u32 %v2883_v59, %v2537_v31 }
 0x8aa   :  { %1398 = vmatpush.bf16.msrb.mxu1 %v2602_v61 }
 0x8ae   :  { %1399 = vmatpush.bf16.msrb.mxu1 %v2590_v7  ;;  %v2880_v7 = vld [vmem:[#allocation7 + $0xd0] sm:$0xf0] }
 0x8af   :  { %v2526_v9 = vor.u32 %v2880_v7, %v2525_v6 }
 0x8b2   :  { %1400 = vmatpush.bf16.msrb.mxu1 %v2578_v16 }
 0x8b6   :  { %1401 = vmatpush.bf16.msrb.mxu1 %v2566_v25 }
 0x8ba   :  { %1402 = vmatpush.bf16.msrb.mxu1 %v2554_v34 }
 0x8be   :  { %1403 = vmatpush.bf16.msrb.mxu1 %v2542_v46 }
 0x914   :  { %v1178_v51 = vpop.xlane.xlu2 %1177 }
 0x915   :  { %v1181_v52 = vmul.f32 %v1178_v51, %v3456_v38  ;;  %v2550_v51 = vor.u32 %v2886_v49, %v2549_v48 }
 0x917   :  { %v3558_v53 = vsub.f32 %v1173_v44, %v1181_v52  ;;  %v2884_v44 = vld [vmem:[#allocation7 + $0xf4] sm:$0xf]  ;;  %1431 = vmatpush.bf16.msra.mxu3 %v2550_v51  ;;  %v2529_v52 = vld [vmem:[#allocation7 + $0xd8] sm:$0xf] }
 0x919   :  { %v1185_v54 = vmul.f32 %v3558_v53, %v3558_v53 }
 0x91b   :  { %1187 = vadd.xlane.f32.xlu2 %v1185_v54  ;;  %v2882_v54 = vld [vmem:[#allocation7 + $0xe0] sm:$0xf0]  ;;  %1432 = vmatpush.bf16.msra.mxu3 %v2538_v62 }
 0x91c   :  { %v1180_v55 = vpop.xlane.xlu2 %1179 }
 0x91d   :  { %v1182_v30 = vmul.f32 %v1180_v55, %v3456_v38  ;;  %v2881_v55 = vld [vmem:[#allocation7 + $0xdc] sm:$0xf] }
 0x91f   :  { %v3563_v56 = vsub.f32 %v1174_v50, %v1182_v30  ;;  %v2546_v50 = vor.u32 %v2884_v44, %v2543_v47  ;;  %v2530_v30 = vor.u32 %v2882_v54, %v2529_v52  ;;  %1433 = vmatpush.bf16.msra.mxu3 %v2526_v9 }
 0x921   :  { %v1186_v58 = vmul.f32 %v3563_v56, %v3563_v56  ;;  %1417 = vmatpush.bf16.msra.mxu2 %v2546_v50  ;;  %1404 = vmatpush.bf16.msrb.mxu1 %v2530_v30 }
 0x923   :  { %1189 = vadd.xlane.f32.xlu2 %v1186_v58  ;;  %v2531_v58 = vld [vmem:[#allocation7 + $0xe4] sm:$0xf0] }
 0x924   :  { %v2534_v61 = vor.u32 %v2881_v55, %v2531_v58 }
 0x925   :  { %1405 = vmatpush.bf16.msrb.mxu1 %v2518_v4 }
 0x926   :  { %1418 = vmatpush.bf16.msra.mxu2 %v2534_v61 }
 0x92a   :  { %1419 = vmatpush.bf16.msra.mxu2 %v2522_v8 }
 0x98e   :  { %v1188_v60 = vpop.xlane.xlu2 %1187 }
 0x98f   :  { %v1191_v3 = vmul.f32 %v1188_v60, %v3456_v38 }
 0x991   :  { %v1193_v10 = vadd.f32 1e-12, %v1191_v3 }
 0x993   :  { %3028 = vrsqrt.f32 %v1193_v10  ;;  %vm1201_vm6 = vweird.f32 %v1193_v10 }
 0x996   :  { %v1190_v12 = vpop.xlane.xlu2 %1189 }
 0x997   :  { %v1192_v13 = vmul.f32 %v1190_v12, %v3456_v38 }
 0x999   :  { %v3029_v14 = vpop.eup %3028  ;;  %v1194_v20 = vadd.f32 1e-12, %v1192_v13 }
 0x99a   :  { %v1196_v21 = vmul.f32 %v3029_v14, %v1193_v10  ;;  %vm1202_vm5 = vweird.f32 %v3029_v14 }
 0x99b   :  { %3030 = vrsqrt.f32 %v1194_v20  ;;  %vm1203_vm7 = vmor %vm1201_vm6, %vm1202_vm5  ;;  %vm1211_vm9 = vweird.f32 %v1194_v20 }
 0x99c   :  { %v1197_v16 = vmul.f32 %v3029_v14, %v1196_v21 }
 0x99e   :  { %v1198_v17 = vmul.f32 0.5, %v1197_v16 }
 0x9a0   :  { %v1199_v18 = vsub.f32 1.5, %v1198_v17 }
 0x9a1   :  { %v3031_v19 = vpop.eup %3030 }
 0x9a2   :  { %v1200_v41 = vmul.f32 %v3029_v14, %v1199_v18  ;;  %v1206_v22 = vmul.f32 %v3031_v19, %v1194_v20  ;;  %vm1212_vm8 = vweird.f32 %v3031_v19 }
 0x9a3   :  { %vm1213_vm10 = vmor %vm1211_vm9, %vm1212_vm8 }
 0x9a4   :  { %v1207_v45 = vmul.f32 %v3031_v19, %v1206_v22  ;;  %v1204_v23 = vsel %vm1203_vm7, %v3029_v14, %v1200_v41 }
 0x9a5   :  { %v1215_v26 = vmul.f32 %v1204_v23, %v3558_v53 }
 0x9a6   :  { %v1208_v24 = vmul.f32 0.5, %v1207_v45 }
 0x9a7   :  { %v1220_v32 = vmul.f32 %v2985_v27, %v1215_v26 }
 0x9a8   :  { %v1209_v25 = vsub.f32 1.5, %v1208_v24 }
 0x9a9   :  { %v3577_v34 = vadd.f32 %v2986_v33, %v1220_v32 }
 0x9aa   :  { %v1210_v28 = vmul.f32 %v3031_v19, %v1209_v25 }
 0x9ac   :  { %v1214_v29 = vsel %vm1213_vm10, %v3031_v19, %v1210_v28 }
 0x9ad   :  { %v1216_v11 = vmul.f32 %v1214_v29, %v3563_v56  ;;  %v2514_v56 = vld [vmem:[%s3683_s9 + $0x3] sm:$0x7] }
 0x9ae   :  { %v1265_v39 = vperm.slane %v2514_v56, 1  ;;  %v1266_v42 = vperm.slane %v2514_v56, 2  ;;  %v1264_v43 = vperm.slane %v2514_v56, 0 }
 0x9af   :  { %v1221_v15 = vmul.f32 %v2985_v27, %v1216_v11 }
 0x9b1   :  { %v3579_v35 = vadd.f32 %v2986_v33, %v1221_v15 }
 0x9b3   :  { %v1227_v53 = vpack.c.bf16 %v3579_v35, %v3577_v34 }
 0x9b5   :  { %1406 = vmatmul.bf16.vlgmr.msrb.gmra.mxu1 %v1227_v53  ;;  %1420 = vmatmul.bf16.vlgmr.msra.gmra.mxu2 %v1227_v53 }
 0x9b6   :  { %1434 = vmatmul.bf16.vlgmr.msra.gmra.mxu3 %v1227_v53 }
 0xa32   :  { %v1407_v36 = vpop.f32.mrf.mxu1 }
 0xa33   :  { %v1408_v48 = vadd.f32 %v1407_v36, %v1264_v43 }
 0xa38   :  { %v1421_v37 = vpop.f32.mrf.mxu2 }
 0xa39   :  { %v1435_v40 = vpop.f32.mrf.mxu3  ;;  %v1422_v44 = vadd.f32 %v1421_v37, %v1265_v39 }
 0xa3a   :  { %v1436_v46 = vadd.f32 %v1435_v40, %v1266_v42  ;;  %v1409_v47 = vpop.f32.mrf.mxu1 }
 0xa3b   :  { %v1440_v50 = vpack.c.bf16 %v1422_v44, %v1408_v48  ;;  %v1410_v51 = vadd.f32 %v1409_v47, %v1264_v43 }
 0xa3c   :  { %v1441_v55 = vpack.c.bf16 %v1436_v46, %v1436_v46 }
 0xa3d   :  { %v1449_v59 = vunpack.c.h.b16 %v1440_v50  ;;  %v1446_v61 = vunpack.c.l.b16 %v1440_v50 }
 0xa3e   :  { %v1497_v63 = vunpack.c.l.b16 %v1441_v55 }
 0xa40   :  { %v1423_v49 = vpop.f32.mrf.mxu2 }
 0xa41   :  { %v1424_v52 = vadd.f32 %v1423_v49, %v1265_v39  ;;  %v1437_v54 = vpop.f32.mrf.mxu3 }
 0xa42   :  { %v1438_v30 = vadd.f32 %v1437_v54, %v1266_v42 }
 0xa43   :  { %v1442_v58 = vpack.c.bf16 %v1424_v52, %v1410_v51 }
 0xa44   :  { %v1443_v31 = vpack.c.bf16 %v1438_v30, %v1438_v30 }
 0xa45   :  { %v1450_v60 = vunpack.c.h.b16 %v1442_v58  ;;  %v1447_v62 = vunpack.c.l.b16 %v1442_v58 }
 0xa46   :  { %v1498_v1 = vunpack.c.l.b16 %v1443_v31 }
 0xa47   :  { %v1451_v2 = vpack.c.b16 %v1450_v60, %v1449_v59  ;;  %v1448_v3 = vpack.c.b16 %v1447_v62, %v1446_v61  ;;  %v2909_v61 = vld [vmem:[#allocation8 + $0x78] sm:$0xff]  ;;  %v2908_v62 = vld [vmem:[#allocation8 + $0x70] sm:$0xff] }
 0xa48   :  { %v1499_v4 = vpack.c.b16 %v1498_v1, %v1497_v63  ;;  %v2907_v63 = vld [vmem:[#allocation8 + $0x68] sm:$0xff]  ;;  %v2906_v1 = vld [vmem:[#allocation8 + $0x60] sm:$0xff] }
 0xa49   :  { %1520 = vrot.lane.b32.xlu1 %v1451_v2, %s3715_s6  ;;  %1518 = vrot.lane.b32.xlu2 %v1448_v3, %s3715_s6  ;;  %v1456_v5 = vsel %vm250_vm0, %v1451_v2, 0  ;;  %v2905_v2 = vld [vmem:[#allocation8 + $0x58] sm:$0xff] }
 0xa4a   :  { %1511 = vmatpush.bf16.msra.mxu1 %v1499_v4  ;;  %1465 = vmatpush.bf16.xpose.msrb.mxu0 %v1456_v5  ;;  %v2902_v5 = vld [vmem:[#allocation8 + $0x40] sm:$0xff] }
 0xa51   :  { %2611 = vmatmul.msk.bf16.vlgmr.msrb.gmra.mxu0 %vm250_vm0, %v1448_v3  ;;  %v2904_v3 = vld [vmem:[#allocation8 + $0x50] sm:$0xff] }
 0xa52   :  { %1666 = vmatpush.bf16.msra.mxu0 %v2909_v61  ;;  %v2914_v61 = vld [vmem:[#allocation10 + $0xa4] sm:$0xf] }
 0xa56   :  { %1667 = vmatpush.bf16.msra.mxu0 %v2908_v62 }
 0xa5a   :  { %1668 = vmatpush.bf16.msra.mxu0 %v2907_v63  ;;  %v2671_v63 = vld [vmem:[#allocation10 + $0xa8] sm:$0xf0] }
 0xa5e   :  { %1669 = vmatpush.bf16.msra.mxu0 %v2906_v1  ;;  %v2674_v1 = vor.u32 %v2914_v61, %v2671_v63  ;;  %v2935_v61 = vld [vmem:[#allocation11 + $0xc8] sm:$0xff] }
 0xa62   :  { %1670 = vmatpush.bf16.msra.mxu0 %v2905_v2  ;;  %v2661_v2 = vld [vmem:[#allocation10 + $0x90] sm:$0xf] }
 0xa66   :  { %1671 = vmatpush.bf16.msra.mxu0 %v2904_v3  ;;  %v2913_v3 = vld [vmem:[#allocation10 + $0x94] sm:$0xf0] }
 0xaa3   :  { %v1519_v8 = vpop.permute.xlu2 %1518 }
 0xabb   :  { %v1521_v6 = vpop.permute.xlu1 %1520 }
 0xabc   :  { %v1526_v7 = vsel %vm250_vm0, %v1521_v6, 0 }
 0xabd   :  { %1535 = vmatpush.bf16.xpose.msrb.mxu2 %v1526_v7 }
 0xac4   :  { %2613 = vmatmul.msk.bf16.vlgmr.msrb.gmra.mxu2 %vm250_vm0, %v1519_v8 }
 0xace   :  { %v1467_v9 = vpop.f32.mrf.mxu0 }
 0xacf   :  { %v1468_v10 = vadd.f32 %v1467_v9, %v3493_v57 }
 0xad1   :  { %v1472_v12 = vsel %vm220_vm3, %v1468_v10, -inf }
 0xad2   :  { %1473 = vmax.xlane.f32.xlu1 %v1472_v12 }
 0xad6   :  { %v1469_v18 = vpop.f32.mrf.mxu0 }
 0xad7   :  { %v1470_v19 = vadd.f32 %v1469_v18, %v3502_v0 }
 0xad9   :  { %v1475_v41 = vsel %vm220_vm3, %v1470_v19, -inf }
 0xb45   :  { %v1474_v53 = vpop.xlane.xlu1 %1473 }
 0xb46   :  { %v1478_v36 = vsub.f32 %v1468_v10, %v1474_v53 }
 0xb47   :  { %v1537_v13 = vpop.f32.mrf.mxu2 }
 0xb48   :  { %v1538_v14 = vadd.f32 %v1537_v13, %v3493_v57  ;;  %v1480_v56 = vmul.f32 1.442695, %v1478_v36  ;;  %v2703_v36 = vld [vmem:[#allocation10 + $0xe8] sm:$0xf0] }
 0xb4a   :  { %v1542_v20 = vsel %vm220_vm3, %v1538_v14, -inf }
 0xb4b   :  { %1543 = vmax.xlane.f32.xlu0 %v1542_v20  ;;  %v2987_v20 = vld [vmem:[%s3685_s11 + $0x1] ss:$0 sm:$0xff] }
 0xb4f   :  { %v1539_v21 = vpop.f32.mrf.mxu2 }
 0xb50   :  { %v1540_v16 = vadd.f32 %v1539_v21, %v3502_v0 }
 0xb52   :  { %v1545_v17 = vsel %vm220_vm3, %v1540_v16, -inf }
 0xb53   :  { %1546 = vmax.xlane.f32.xlu0 %v1545_v17 }
 0xb5b   :  { %1476 = vmax.xlane.f32.xlu0 %v1475_v41 }
 0xbbe   :  { %v1544_v22 = vpop.xlane.xlu0 %1543 }
 0xbbf   :  { %v1548_v45 = vsub.f32 %v1538_v14, %v1544_v22 }
 0xbc1   :  { %v1550_v23 = vmul.f32 1.442695, %v1548_v45 }
 0xbc3   :  { %3032 = vpow2.f32 %v1550_v23 }
 0xbc6   :  { %v1547_v57 = vpop.xlane.xlu0 %1546 }
 0xbc7   :  { %v1549_v24 = vsub.f32 %v1540_v16, %v1547_v57 }
 0xbc9   :  { %v3033_v25 = vpop.eup %3032  ;;  %v1552_v26 = vmul.f32 1.442695, %v1549_v24 }
 0xbca   :  { %v1554_v27 = vsel %vm220_vm3, %v3033_v25, 0.0 }
 0xbcb   :  { %3034 = vpow2.f32 %v1552_v26  ;;  %1555 = vadd.xlane.f32.xlu2 %v1554_v27  ;;  %v2925_v27 = vld [vmem:[#allocation10 + $0xf4] sm:$0xf0] }
 0xbce   :  { %v1477_v28 = vpop.xlane.xlu0 %1476 }
 0xbcf   :  { %v1479_v29 = vsub.f32 %v1470_v19, %v1477_v28  ;;  %v2924_v28 = vld [vmem:[#allocation10 + $0xf4] sm:$0xf] }
 0xbd1   :  { %v3035_v11 = vpop.eup %3034  ;;  %v1482_v32 = vmul.f32 1.442695, %v1479_v29 }
 0xbd2   :  { %v1557_v0 = vsel %vm220_vm3, %v3035_v11, 0.0 }
 0xbd3   :  { %3036 = vpow2.f32 %v1482_v32  ;;  %1558 = vadd.xlane.f32.xlu0 %v1557_v0  ;;  %v2701_v0 = vld [vmem:[#allocation10 + $0xe0] sm:$0xf] }
 0xbd4   :  { %3038 = vpow2.f32 %v1480_v56 }
 0xbd9   :  { %v3037_v33 = vpop.eup %3036 }
 0xbda   :  { %v1487_v15 = vsel %vm220_vm3, %v3037_v33, 0.0  ;;  %v3039_v37 = vpop.eup %3038 }
 0xbdb   :  { %1488 = vadd.xlane.f32.xlu1 %v1487_v15  ;;  %v1484_v39 = vsel %vm220_vm3, %v3039_v37, 0.0  ;;  %v2922_v15 = vld [vmem:[#allocation10 + $0xe4] sm:$0xf] }
 0xbdc   :  { %v2706_v56 = vor.u32 %v2922_v15, %v2703_v36 }
 0xbe7   :  { %1565 = vrot.lane.b32.xlu0 %v1499_v4, %s3715_s6  ;;  %v2903_v4 = vld [vmem:[#allocation8 + $0x48] sm:$0xff] }
 0xbe8   :  { %1672 = vmatpush.bf16.msra.mxu0 %v2903_v4  ;;  %v2912_v4 = vld [vmem:[#allocation10 + $0x94] sm:$0xf] }
 0xbec   :  { %1673 = vmatpush.bf16.msra.mxu0 %v2902_v5  ;;  %v2662_v5 = vor.u32 %v2913_v3, %v2661_v2  ;;  %v2934_v3 = vld [vmem:[#allocation11 + $0xc0] sm:$0xff] }
 0xc11   :  { %1485 = vadd.xlane.f32.xlu0 %v1484_v39  ;;  %v2921_v39 = vld [vmem:[#allocation10 + $0xd4] sm:$0xf0] }
 0xc3e   :  { %v1556_v42 = vpop.xlane.xlu2 %1555 }
 0xc46   :  { %v1559_v40 = vpop.xlane.xlu0 %1558 }
 0xc47   :  { %3040 = vrcp.f32 %v1559_v40  ;;  %v2920_v40 = vld [vmem:[#allocation10 + $0xd4] sm:$0xf] }
 0xc48   :  { %3042 = vrcp.f32 %v1556_v42 }
 0xc4d   :  { %v3041_v43 = vpop.eup %3040 }
 0xc4e   :  { %v3043_v44 = vpop.eup %3042  ;;  %v1563_v46 = vmul.f32 %v3041_v43, %v3035_v11  ;;  %v1489_v50 = vpop.xlane.xlu1 %1488  ;;  %v2711_v11 = vld [vmem:[#allocation10 + $0xf8] sm:$0xf0] }
 0xc4f   :  { %v1562_v47 = vmul.f32 %v3043_v44, %v3033_v25  ;;  %3044 = vrcp.f32 %v1489_v50  ;;  %v2714_v32 = vor.u32 %v2924_v28, %v2711_v11  ;;  %v2695_v43 = vld [vmem:[#allocation10 + $0xd8] sm:$0xf0]  ;;  %v2687_v50 = vld [vmem:[#allocation10 + $0xc8] sm:$0xf0] }
 0xc50   :  { %v2698_v44 = vor.u32 %v2920_v40, %v2695_v43  ;;  %v2932_v43 = vld [vmem:[#allocation11 + $0xb0] sm:$0xff] }
 0xc51   :  { %v1564_v49 = vpack.c.bf16 %v1563_v46, %v1562_v47  ;;  %1855 = vmatpush.bf16.msra.mxu2 %v2714_v32  ;;  %v2685_v46 = vld [vmem:[#allocation10 + $0xc0] sm:$0xf]  ;;  %v2919_v47 = vld [vmem:[#allocation10 + $0xc4] sm:$0xf0] }
 0xc55   :  { %v3045_v52 = vpop.eup %3044  ;;  %1856 = vmatpush.bf16.msra.mxu2 %v2706_v56  ;;  %v2989_v56 = vld [vmem:[%s3687_s13 + $0x1] ss:$0 sm:$0xff] }
 0xc56   :  { %v1493_v55 = vmul.f32 %v3045_v52, %v3037_v33  ;;  %v2923_v33 = vld [vmem:[#allocation10 + $0xe4] sm:$0xf0]  ;;  %v2677_v52 = vld [vmem:[#allocation10 + $0xb0] sm:$0xf] }
 0xc57   :  { %v2702_v53 = vor.u32 %v2923_v33, %v2701_v0  ;;  %v2988_v0 = vld [vmem:[%s3686_s12 + $0x1] ss:$0 sm:$0xff] }
 0xc59   :  { %v1566_v48 = vpop.permute.xlu0 %1565  ;;  %1857 = vmatpush.bf16.msra.mxu2 %v2698_v44  ;;  %v2931_v44 = vld [vmem:[#allocation11 + $0xa8] sm:$0xff] }
 0xc5a   :  { %1578 = vmatpush.bf16.msrb.mxu3 %v1566_v48  ;;  %v2918_v48 = vld [vmem:[#allocation10 + $0xc4] sm:$0xf] }
 0xc5d   :  { %2614 = vmatmul.msk.bf16.vlgmr.msrb.gmra.mxu3 %vm220_vm3, %v1564_v49  ;;  %v2686_v49 = vor.u32 %v2919_v47, %v2685_v46  ;;  %v2940_v46 = vld [vmem:[#allocation11 + $0xf0] sm:$0xff]  ;;  %v2930_v47 = vld [vmem:[#allocation11 + $0xa0] sm:$0xff] }
 0xc84   :  { %v1486_v51 = vpop.xlane.xlu0 %1485 }
 0xc85   :  { %3046 = vrcp.f32 %v1486_v51  ;;  %v2690_v51 = vor.u32 %v2918_v48, %v2687_v50  ;;  %v2939_v48 = vld [vmem:[#allocation11 + $0xe8] sm:$0xff]  ;;  %v2938_v50 = vld [vmem:[#allocation11 + $0xe0] sm:$0xff] }
 0xc87   :  { %1858 = vmatpush.bf16.msra.mxu2 %v2690_v51  ;;  %v2928_v51 = vld [vmem:[#allocation11 + $0x90] sm:$0xff] }
 0xc8b   :  { %v3047_v54 = vpop.eup %3046 }
 0xc8c   :  { %v1492_v30 = vmul.f32 %v3047_v54, %v3039_v37  ;;  %v2693_v37 = vld [vmem:[#allocation10 + $0xd0] sm:$0xf]  ;;  %v2917_v54 = vld [vmem:[#allocation10 + $0xb4] sm:$0xf0] }
 0xc8d   :  { %v2694_v42 = vor.u32 %v2921_v39, %v2693_v37 }
 0xc8e   :  { %v1494_v58 = vpack.c.bf16 %v1493_v55, %v1492_v30  ;;  %v2916_v55 = vld [vmem:[#allocation10 + $0xb4] sm:$0xf]  ;;  %v2678_v30 = vor.u32 %v2917_v54, %v2677_v52  ;;  %v2650_v52 = vld [vmem:[%s3689_s15 + $0x2] sm:$0x3]  ;;  %v2937_v54 = vld [vmem:[#allocation11 + $0xd8] sm:$0xff] }
 0xc8f   :  { %v1758_v63 = vperm.slane %v2650_v52, 1 }
 0xc90   :  { %2612 = vmatmul.msk.bf16.vlgmr.msra.gmra.mxu1 %vm220_vm3, %v1494_v58  ;;  %v2679_v58 = vld [vmem:[#allocation10 + $0xb8] sm:$0xf0] }
 0xce0   :  { %v1580_v31 = vpop.f32.mrf.mxu3 }
 0xce8   :  { %v1582_v59 = vpop.f32.mrf.mxu3 }
 0xce9   :  { %v2974_v60 = vpack.i.bf16 %v1582_v59, %v1580_v31  ;;  %v2682_v31 = vor.u32 %v2916_v55, %v2679_v58  ;;  %v2669_v59 = vld [vmem:[#allocation10 + $0xa0] sm:$0xf]  ;;  %v2927_v55 = vld [vmem:[#allocation11 + $0x88] sm:$0xff]  ;;  %v2936_v58 = vld [vmem:[#allocation11 + $0xd0] sm:$0xff] }
 0xceb   :  { %2975 = vrot.lane.b32.xlu2 %v2974_v60, %s3715_s6  ;;  %1859 = vmatpush.bf16.msra.mxu2 %v2682_v31  ;;  %v2915_v60 = vld [vmem:[#allocation10 + $0xa4] sm:$0xf0] }
 0xcec   :  { %v2670_v62 = vor.u32 %v2915_v60, %v2669_v59  ;;  %v2926_v59 = vld [vmem:[#allocation11 + $0x80] sm:$0xff] }
 0xcef   :  { %1860 = vmatpush.bf16.msra.mxu2 %v2674_v1 }
 0xd0d   :  { %v1513_v6 = vpop.f32.mrf.mxu1 }
 0xd15   :  { %v1515_v10 = vpop.f32.mrf.mxu1 }
 0xd45   :  { %v2976_v7 = vpop.permute.xlu2 %2975 }
 0xd46   :  { %v2978_v8 = vunpack.i.h.bf16 %v2976_v7  ;;  %v2977_v9 = vunpack.i.l.bf16 %v2976_v7  ;;  %v2653_v7 = vld [vmem:[#allocation10 + $0x80] sm:$0xf] }
 0xd48   :  { %v1593_v12 = vsel %vm250_vm0, %v1513_v6, %v2977_v9  ;;  %v1594_v13 = vsel %vm250_vm0, %v1515_v10, %v2978_v8  ;;  %v2663_v6 = vld [vmem:[#allocation10 + $0x98] sm:$0xf0]  ;;  %v2911_v8 = vld [vmem:[#allocation10 + $0x84] sm:$0xf0] }
 0xd49   :  { %v1595_v14 = vpack.c.bf16 %v1594_v13, %v1593_v12  ;;  %v2666_v10 = vor.u32 %v2912_v4, %v2663_v6  ;;  %v2910_v12 = vld [vmem:[#allocation10 + $0x84] sm:$0xf]  ;;  %v2655_v13 = vld [vmem:[#allocation10 + $0x88] sm:$0xf0] }
 0xd4b   :  { %1674 = vmatmul.bf16.vlgmr.msra.gmra.mxu0 %v1595_v14  ;;  %1861 = vmatpush.bf16.msra.mxu2 %v2666_v10 }
 0xdc8   :  { %v1675_v21 = vpop.f32.mrf.mxu0 }
 0xdc9   :  { %v1676_v16 = vadd.f32 %v2987_v20, %v1675_v21  ;;  %v2658_v21 = vor.u32 %v2910_v12, %v2655_v13 }
 0xdcb   :  { %v1680_v17 = vadd.f32 %v1676_v16, %v3577_v34  ;;  %1862 = vmatpush.bf16.msra.mxu2 %v2658_v21 }
 0xdcd   :  { %1686 = vadd.xlane.f32.xlu1 %v1680_v17 }
 0xdd0   :  { %v1677_v18 = vpop.f32.mrf.mxu0 }
 0xdd1   :  { %v1678_v19 = vadd.f32 %v2987_v20, %v1677_v18  ;;  %v2654_v20 = vor.u32 %v2911_v8, %v2653_v7 }
 0xdd3   :  { %v1681_v41 = vadd.f32 %v1678_v19, %v3579_v35  ;;  %v2709_v35 = vld [vmem:[#allocation10 + $0xf0] sm:$0xf] }
 0xdd4   :  { %v2710_v29 = vor.u32 %v2925_v27, %v2709_v35 }
 0xdd5   :  { %1688 = vadd.xlane.f32.xlu1 %v1681_v41 }
 0xdd6   :  { %1841 = vmatpush.bf16.msrb.mxu1 %v2710_v29 }
 0xdda   :  { %1842 = vmatpush.bf16.msrb.mxu1 %v2702_v53 }
 0xdde   :  { %1843 = vmatpush.bf16.msrb.mxu1 %v2694_v42  ;;  %v2933_v42 = vld [vmem:[#allocation11 + $0xb8] sm:$0xff] }
 0xddf   :  { %2041 = vmatpush.bf16.msra.mxu3 %v2933_v42 }
 0xde2   :  { %1844 = vmatpush.bf16.msrb.mxu1 %v2686_v49  ;;  %v2929_v49 = vld [vmem:[#allocation11 + $0x98] sm:$0xff] }
 0xde3   :  { %2042 = vmatpush.bf16.msra.mxu3 %v2932_v43 }
 0xde6   :  { %1845 = vmatpush.bf16.msrb.mxu1 %v2678_v30  ;;  %v1757_v30 = vperm.slane %v2650_v52, 0 }
 0xde7   :  { %2043 = vmatpush.bf16.msra.mxu3 %v2931_v44 }
 0xdea   :  { %1846 = vmatpush.bf16.msrb.mxu1 %v2670_v62 }
 0xdeb   :  { %2044 = vmatpush.bf16.msra.mxu3 %v2930_v47 }
 0xdee   :  { %1847 = vmatpush.bf16.msrb.mxu1 %v2662_v5 }
 0xdef   :  { %2045 = vmatpush.bf16.msra.mxu3 %v2929_v49 }
 0xdf2   :  { %1848 = vmatpush.bf16.msrb.mxu1 %v2654_v20 }
 0xdf3   :  { %2046 = vmatpush.bf16.msra.mxu3 %v2928_v51 }
 0xdf7   :  { %2047 = vmatpush.bf16.msra.mxu3 %v2927_v55 }
 0xdfb   :  { %2048 = vmatpush.bf16.msra.mxu3 %v2926_v59 }
 0xe40   :  { %v1687_v22 = vpop.xlane.xlu1 %1686 }
 0xe41   :  { %v1690_v45 = vmul.f32 %v1687_v22, %v3456_v38 }
 0xe43   :  { %v3616_v23 = vsub.f32 %v1680_v17, %v1690_v45 }
 0xe45   :  { %v1694_v57 = vmul.f32 %v3616_v23, %v3616_v23 }
 0xe47   :  { %1696 = vadd.xlane.f32.xlu1 %v1694_v57 }
 0xe48   :  { %v1689_v24 = vpop.xlane.xlu1 %1688 }
 0xe49   :  { %v1691_v25 = vmul.f32 %v1689_v24, %v3456_v38 }
 0xe4b   :  { %v3621_v26 = vsub.f32 %v1681_v41, %v1691_v25 }
 0xe4d   :  { %v1695_v34 = vmul.f32 %v3621_v26, %v3621_v26 }
 0xe4f   :  { %1698 = vadd.xlane.f32.xlu2 %v1695_v34 }
 0xeba   :  { %v1697_v9 = vpop.xlane.xlu1 %1696 }
 0xebb   :  { %v1700_v14 = vmul.f32 %v1697_v9, %v3456_v38 }
 0xebd   :  { %v1702_v16 = vadd.f32 1e-12, %v1700_v14 }
 0xebf   :  { %3048 = vrsqrt.f32 %v1702_v16  ;;  %vm1710_vm3 = vweird.f32 %v1702_v16 }
 0xec2   :  { %v1699_v17 = vpop.xlane.xlu2 %1698 }
 0xec3   :  { %v1701_v18 = vmul.f32 %v1699_v17, %v3456_v38 }
 0xec5   :  { %v3049_v19 = vpop.eup %3048  ;;  %v1703_v41 = vadd.f32 1e-12, %v1701_v18 }
 0xec6   :  { %v1705_v22 = vmul.f32 %v3049_v19, %v1702_v16  ;;  %vm1711_vm0 = vweird.f32 %v3049_v19 }
 0xec7   :  { %3050 = vrsqrt.f32 %v1703_v41  ;;  %vm1712_vm11 = vmor %vm1710_vm3, %vm1711_vm0  ;;  %vm1720_vm13 = vweird.f32 %v1703_v41 }
 0xec8   :  { %v1706_v45 = vmul.f32 %v3049_v19, %v1705_v22 }
 0xeca   :  { %v1707_v57 = vmul.f32 0.5, %v1706_v45 }
 0xecc   :  { %v1708_v24 = vsub.f32 1.5, %v1707_v57 }
 0xecd   :  { %v3051_v25 = vpop.eup %3050 }
 0xece   :  { %v1709_v34 = vmul.f32 %v3049_v19, %v1708_v24  ;;  %v1715_v35 = vmul.f32 %v3051_v25, %v1703_v41  ;;  %vm1721_vm12 = vweird.f32 %v3051_v25 }
 0xecf   :  { %vm1722_vm14 = vmor %vm1720_vm13, %vm1721_vm12 }
 0xed0   :  { %v1716_v27 = vmul.f32 %v3051_v25, %v1715_v35  ;;  %v1713_v28 = vsel %vm1712_vm11, %v3049_v19, %v1709_v34 }
 0xed1   :  { %v1724_v32 = vmul.f32 %v1713_v28, %v3616_v23 }
 0xed2   :  { %v1717_v29 = vmul.f32 0.5, %v1716_v27 }
 0xed3   :  { %v1729_v36 = vmul.f32 %v2988_v0, %v1724_v32 }
 0xed4   :  { %v1718_v11 = vsub.f32 1.5, %v1717_v29 }
 0xed5   :  { %v3635_v39 = vadd.f32 %v2989_v56, %v1729_v36 }
 0xed6   :  { %v1719_v33 = vmul.f32 %v3051_v25, %v1718_v11 }
 0xed8   :  { %v1723_v15 = vsel %vm1722_vm14, %v3051_v25, %v1719_v33 }
 0xed9   :  { %v1725_v53 = vmul.f32 %v1723_v15, %v3621_v26  ;;  %v2941_v26 = vld [vmem:[#allocation11 + $0xf8] sm:$0xff] }
 0xeda   :  { %2055 = vmatpush.bf16.msrb.mxu0 %v2941_v26 }
 0xedb   :  { %v1730_v37 = vmul.f32 %v2988_v0, %v1725_v53 }
 0xedd   :  { %v3637_v40 = vadd.f32 %v2989_v56, %v1730_v37 }
 0xede   :  { %2056 = vmatpush.bf16.msrb.mxu0 %v2940_v46  ;;  %v2990_v46 = vld [vmem:[%s3691_s17 + $0x1] ss:$0 sm:$0xff] }
 0xedf   :  { %v1736_v23 = vpack.c.bf16 %v3637_v40, %v3635_v39 }
 0xee1   :  { %1849 = vmatmul.bf16.vlgmr.msrb.gmra.mxu1 %v1736_v23  ;;  %1863 = vmatmul.bf16.vlgmr.msra.gmra.mxu2 %v1736_v23 }
 0xee2   :  { %2057 = vmatpush.bf16.msrb.mxu0 %v2939_v48 }
 0xee6   :  { %2058 = vmatpush.bf16.msrb.mxu0 %v2938_v50 }
 0xeea   :  { %2059 = vmatpush.bf16.msrb.mxu0 %v2937_v54 }
 0xeee   :  { %2060 = vmatpush.bf16.msrb.mxu0 %v2936_v58 }
 0xef2   :  { %2061 = vmatpush.bf16.msrb.mxu0 %v2935_v61 }
 0xef6   :  { %2062 = vmatpush.bf16.msrb.mxu0 %v2934_v3  ;;  %v2949_v3 = vld [vmem:[#allocation13 + $0x38] sm:$0xff] }
 0xef7   :  { %2208 = vmatpush.bf16.msra.mxu1 %v2949_v3 }
 0xf5e   :  { %v1850_v31 = vpop.f32.mrf.mxu1 }
 0xf5f   :  { %v1851_v60 = vadd.f32 %v1850_v31, %v1757_v30 }
 0xf61   :  { %v1869_v62 = vmul.f32 %v1851_v60, %v1851_v60 }
 0xf63   :  { %v1873_v1 = vmul.f32 %v1869_v62, %v1851_v60 }
 0xf64   :  { %v1864_v2 = vpop.f32.mrf.mxu2 }
 0xf65   :  { %v1877_v4 = vmul.f32 0.044715, %v1873_v1  ;;  %v1865_v5 = vadd.f32 %v1864_v2, %v1758_v63 }
 0xf66   :  { %v1852_v6 = vpop.f32.mrf.mxu1 }
 0xf67   :  { %v1881_v7 = vadd.f32 %v1877_v4, %v1851_v60  ;;  %v1870_v8 = vmul.f32 %v1865_v5, %v1865_v5  ;;  %v1853_v9 = vadd.f32 %v1852_v6, %v1757_v30  ;;  %v2948_v4 = vld [vmem:[#allocation13 + $0x30] sm:$0xff]  ;;  %v2946_v6 = vld [vmem:[#allocation13 + $0x20] sm:$0xff] }
 0xf68   :  { %2209 = vmatpush.bf16.msra.mxu1 %v2948_v4 }
 0xf69   :  { %v1885_v10 = vmul.f32 0.7978846, %v1881_v7  ;;  %v1874_v12 = vmul.f32 %v1870_v8, %v1865_v5  ;;  %v1871_v13 = vmul.f32 %v1853_v9, %v1853_v9  ;;  %v2945_v7 = vld [vmem:[#allocation13 + $0x18] sm:$0xff]  ;;  %v2944_v8 = vld [vmem:[#allocation13 + $0x10] sm:$0xff] }
 0xf6b   :  { %v1878_v14 = vmul.f32 0.044715, %v1874_v12  ;;  %v1875_v20 = vmul.f32 %v1871_v13, %v1853_v9  ;;  %3052 = vtanh.f32 %v1885_v10  ;;  %v2943_v12 = vld [vmem:[#allocation13 + $0x8] sm:$0xff] }
 0xf6c   :  { %v1866_v21 = vpop.f32.mrf.mxu2 }
 0xf6d   :  { %v1882_v16 = vadd.f32 %v1878_v14, %v1865_v5  ;;  %v1879_v17 = vmul.f32 0.044715, %v1875_v20  ;;  %v1867_v18 = vadd.f32 %v1866_v21, %v1758_v63  ;;  %v2942_v14 = vld [vmem:[#allocation13] sm:$0xff] }
 0xf6f   :  { %v1886_v19 = vmul.f32 0.7978846, %v1882_v16  ;;  %v1883_v41 = vadd.f32 %v1879_v17, %v1853_v9  ;;  %v1872_v22 = vmul.f32 %v1867_v18, %v1867_v18 }
 0xf71   :  { %v1887_v45 = vmul.f32 0.7978846, %v1883_v41  ;;  %v1876_v57 = vmul.f32 %v1872_v22, %v1867_v18  ;;  %3054 = vtanh.f32 %v1886_v19  ;;  %v3053_v24 = vpop.eup %3052 }
 0xf72   :  { %v1893_v35 = vadd.f32 1.0, %v3053_v24 }
 0xf73   :  { %3056 = vtanh.f32 %v1887_v45  ;;  %v1880_v25 = vmul.f32 0.044715, %v1876_v57 }
 0xf74   :  { %v1897_v11 = vmul.f32 0.5, %v1893_v35 }
 0xf75   :  { %v1884_v34 = vadd.f32 %v1880_v25, %v1867_v18 }
 0xf76   :  { %v1901_v15 = vmul.f32 %v1897_v11, %v1851_v60 }
 0xf77   :  { %v1888_v27 = vmul.f32 0.7978846, %v1884_v34  ;;  %v3055_v28 = vpop.eup %3054 }
 0xf78   :  { %v1894_v0 = vadd.f32 1.0, %v3055_v28 }
 0xf79   :  { %v3057_v29 = vpop.eup %3056  ;;  %3058 = vtanh.f32 %v1888_v27 }
 0xf7a   :  { %v1895_v32 = vadd.f32 1.0, %v3057_v29  ;;  %v1898_v56 = vmul.f32 0.5, %v1894_v0 }
 0xf7c   :  { %v1899_v33 = vmul.f32 0.5, %v1895_v32  ;;  %v1902_v43 = vmul.f32 %v1898_v56, %v1865_v5  ;;  %v2947_v5 = vld [vmem:[#allocation13 + $0x28] sm:$0xff]  ;;  %v2992_v32 = vld [vmem:[%s3693_s19 + $0x1] ss:$0 sm:$0xff]  ;;  %s2228_s19 = sshll.u32 %s3282_s20, 4  ;;  %s2229_s19 = int_to_ptr.vmem [resolvable:$true] %s2228_s19 }
 0xf7d   :  { %2210 = vmatpush.bf16.msra.mxu1 %v2947_v5 }
 0xf7e   :  { %v1903_v53 = vmul.f32 %v1899_v33, %v1853_v9 }
 0xf7f   :  { %v3059_v36 = vpop.eup %3058 }
 0xf80   :  { %v1896_v37 = vadd.f32 1.0, %v3059_v36  ;;  %v1905_v23 = vpack.c.bf16 %v1903_v53, %v1901_v15 }
 0xf81   :  { %2211 = vmatpush.bf16.msra.mxu1 %v2946_v6 }
 0xf82   :  { %v1900_v42 = vmul.f32 0.5, %v1896_v37  ;;  %2049 = vmatmul.bf16.vlgmr.msra.gmra.mxu3 %v1905_v23 }
 0xf84   :  { %v1904_v26 = vmul.f32 %v1900_v42, %v1867_v18 }
 0xf85   :  { %2212 = vmatpush.bf16.msra.mxu1 %v2945_v7 }
 0xf86   :  { %v1906_v44 = vpack.c.bf16 %v1904_v26, %v1902_v43  ;;  %v2993_v26 = vld [vmem:[%s3695_s21] ss:$0 sm:$0xff] }
 0xf88   :  { %2063 = vmatmul.bf16.vlgmr.msrb.gmra.mxu0 %v1906_v44 }
 0xf89   :  { %2213 = vmatpush.bf16.msra.mxu1 %v2944_v8 }
 0xf8d   :  { %2214 = vmatpush.bf16.msra.mxu1 %v2943_v12 }
 0xf91   :  { %2215 = vmatpush.bf16.msra.mxu1 %v2942_v14 }
0x1005   :  { %v2050_v47 = vpop.f32.mrf.mxu3  ;;  %v2064_v48 = vpop.f32.mrf.mxu0 }
0x1006   :  { %v2051_v49 = vadd.f32 %v2990_v46, %v2050_v47 }
0x1008   :  { %v2065_v50 = vadd.f32 %v2064_v48, %v2051_v49 }
0x100a   :  { %v2069_v51 = vadd.f32 %v2065_v50, %v3635_v39  ;;  %v2125_v39 = vld [vmem:[%s3720_s30] sm:$0xff] }
0x100c   :  { %2075 = vadd.xlane.f32.xlu1 %v2069_v51 }
0x100d   :  { %v2052_v52 = vpop.f32.mrf.mxu3  ;;  %v2066_v55 = vpop.f32.mrf.mxu0 }
0x100e   :  { %v2053_v54 = vadd.f32 %v2990_v46, %v2052_v52 }
0x1010   :  { %v2067_v30 = vadd.f32 %v2066_v55, %v2053_v54 }
0x1012   :  { %v2070_v58 = vadd.f32 %v2067_v30, %v3637_v40  ;;  %v2126_v40 = vld [vmem:[%s3720_s30 + $0x8] sm:$0xff] }
0x1014   :  { %2077 = vadd.xlane.f32.xlu0 %v2070_v58 }
0x107f   :  { %v2076_v31 = vpop.xlane.xlu1 %2075 }
0x1080   :  { %v2079_v59 = vmul.f32 %v2076_v31, %v3456_v38 }
0x1082   :  { %v2081_v60 = vsub.f32 %v2069_v51, %v2079_v59 }
0x1084   :  { %v2083_v61 = vmul.f32 %v2081_v60, %v2081_v60 }
0x1086   :  { %2085 = vadd.xlane.f32.xlu1 %v2083_v61 }
0x1087   :  { %v2078_v62 = vpop.xlane.xlu0 %2077 }
0x1088   :  { %v2080_v63 = vmul.f32 %v2078_v62, %v3456_v38 }
0x108a   :  { %v2082_v1 = vsub.f32 %v2070_v58, %v2080_v63 }
0x108c   :  { %v2084_v2 = vmul.f32 %v2082_v1, %v2082_v1 }
0x108e   :  { %2087 = vadd.xlane.f32.xlu0 %v2084_v2 }
0x109f   :  { %2129 = vperm.xlu1 %2968, %v2125_v39  }
0x10a2   :  { %2134 = vperm.xlu0 %2967, %v2126_v40  }
0x10f9   :  { %v2086_v9 = vpop.xlane.xlu1 %2085 }
0x10fa   :  { %v2089_v10 = vmul.f32 %v2086_v9, %v3456_v38 }
0x10fc   :  { %v2091_v13 = vadd.f32 1e-12, %v2089_v10 }
0x10fe   :  { %3060 = vrsqrt.f32 %v2091_v13  ;;  %vm2099_vm1 = vweird.f32 %v2091_v13 }
0x1101   :  { %v2088_v20 = vpop.xlane.xlu0 %2087 }
0x1102   :  { %v2090_v21 = vmul.f32 %v2088_v20, %v3456_v38  ;;  %v2991_v38 = vld [vmem:[%s3692_s18 + $0x1] ss:$0 sm:$0xff] }
0x1104   :  { %v3061_v16 = vpop.eup %3060  ;;  %v2092_v17 = vadd.f32 1e-12, %v2090_v21 }
0x1105   :  { %v2094_v18 = vmul.f32 %v3061_v16, %v2091_v13  ;;  %vm2100_vm15 = vweird.f32 %v3061_v16 }
0x1106   :  { %3062 = vrsqrt.f32 %v2092_v17  ;;  %vm2101_vm2 = vmor %vm2099_vm1, %vm2100_vm15  ;;  %vm2109_vm5 = vweird.f32 %v2092_v17 }
0x1107   :  { %v2095_v19 = vmul.f32 %v3061_v16, %v2094_v18 }
0x1109   :  { %v2096_v41 = vmul.f32 0.5, %v2095_v19 }
0x110b   :  { %v2097_v22 = vsub.f32 1.5, %v2096_v41 }
0x110c   :  { %v3063_v45 = vpop.eup %3062 }
0x110d   :  { %v2098_v57 = vmul.f32 %v3061_v16, %v2097_v22  ;;  %v2104_v24 = vmul.f32 %v3063_v45, %v2092_v17  ;;  %vm2110_vm4 = vweird.f32 %v3063_v45 }
0x110e   :  { %vm2111_vm6 = vmor %vm2109_vm5, %vm2110_vm4 }
0x110f   :  { %v2105_v25 = vmul.f32 %v3063_v45, %v2104_v24  ;;  %v2102_v34 = vsel %vm2101_vm2, %v3061_v16, %v2098_v57 }
0x1110   :  { %v2113_v27 = vmul.f32 %v2102_v34, %v2081_v60 }
0x1111   :  { %v2106_v35 = vmul.f32 0.5, %v2105_v25  ;;  %v2130_v56 = vpop.permute.xlu1 %2129 }
0x1112   :  { %v2118_v11 = vmul.f32 %v2991_v38, %v2113_v27 }
0x1113   :  { %v2107_v28 = vsub.f32 1.5, %v2106_v35 }
0x1114   :  { %v2123_v15 = vadd.f32 %v2992_v32, %v2118_v11  ;;  %v2135_v37 = vpop.permute.xlu0 %2134 }
0x1115   :  { %v2108_v29 = vmul.f32 %v3063_v45, %v2107_v28 }
0x1116   :  { %v2137_v23 = vmul.f32 %v2130_v56, %v2123_v15 }
0x1117   :  { %v2112_v0 = vsel %vm2111_vm6, %v3063_v45, %v2108_v29 }
0x1118   :  { %v2114_v33 = vmul.f32 %v2112_v0, %v2082_v1 }
0x111a   :  { %v2119_v53 = vmul.f32 %v2991_v38, %v2114_v33 }
0x111c   :  { %v2124_v36 = vadd.f32 %v2992_v32, %v2119_v53 }
0x111e   :  { %v2138_v42 = vmul.f32 %v2135_v37, %v2124_v36 }
0x1120   :  { %v2139_v43 = vpack.c.bf16 %v2138_v42, %v2137_v23 }
0x1122   :  { %2216 = vmatmul.bf16.vlgmr.msra.gmra.mxu1 %v2139_v43 }
0x119f   :  { %v2217_v44 = vpop.f32.mrf.mxu1 }
0x11a0   :  { %v2218_v46 = vadd.f32 %v2993_v26, %v2217_v44 }
0x11a2   :  { %2222 = vst [vmem:[#allocation14] sm:$0xff] %v2218_v46 }
0x11a7   :  { %v2219_v47 = vpop.f32.mrf.mxu1 }
0x11a8   :  { %v2220_v48 = vadd.f32 %v2993_v26, %v2219_v47 }
0x11aa   :  { %2223 = vst [vmem:[#allocation14 + $0x8] sm:$0xff] %v2220_v48 }
0x11ab   :  { %2236 = dma.vmem_to_hbm [thread:$0]  %s2229_s19, 256, %s2231_s26, [#allocation4], %s3272_s5, %s3272_s5, %s3273_s24  }
0x11ac   :  { %3264 = dma.done.wait [#allocation4], 256  }
0x11ad   :  { %3265 = vsyncadd [#allocation4], 4294967040 }
0x11ae   :  { %2241 = vsyncpa [#allocation3], 1 }
0x11af   :  { %2242 = vsyncpa [#allocation6], 1 }
0x11b0   :  { %2243 = vsyncpa [#allocation9], 1 }
0x11b1   :  { %2244 = vsyncpa [#allocation12], 1 }
0x11b2   :  { %2245 = vsyncpa [#allocation4], 1 }

</bundles_post_ra>
